<compile_context>
chip_gen: v7x
topology: tpu7x:2x2x1
jax: 0.10.0
libtpu: 0.0.40
codegen_flags: <defaults>
</compile_context>

<pallas_src>
import numpy as np
import jax
import jax.numpy as jnp
from jax import lax
from jax.experimental import pallas as pl
from jax.experimental.pallas import tpu as pltpu

# ---- synthetic "hp" hyperparameters (small) ----
HP_DIM = 16           # hp.dim           : input feature dim
HP_COMPUTE_DIM = 32   # hp.compute_dim   : internal channel dim
HP_WAV2VEC_DIM = 32   # hp.wav2vec_dim   : sequence length; AvgPool1d kernel = //4
NUM_RESBLOCKS = 2
BATCH = 2
BN_EPS = 1e-5


# ----------------- in-kernel helpers (traced inside the Pallas kernel) -----------------
def _row_is(shape, rows):
    """Boolean mask over `shape`, True on the listed (static) flat row indices."""
    r = lax.broadcasted_iota(jnp.int32, shape, 0)
    m = r == rows[0]
    for v in rows[1:]:
        m = m | (r == v)
    return m


def _shift_down(x, start_rows):
    """Left neighbor along the flat sequence: out[r] = x[r-1], zero on per-batch first rows."""
    z = jnp.zeros((1, x.shape[1]), jnp.float32)
    y = jnp.concatenate([z, x[:-1, :]], axis=0)
    return jnp.where(_row_is(x.shape, start_rows), 0.0, y)


def _shift_up(x, end_rows):
    """Right neighbor along the flat sequence: out[r] = x[r+1], zero on per-batch last rows."""
    z = jnp.zeros((1, x.shape[1]), jnp.float32)
    y = jnp.concatenate([x[1:, :], z], axis=0)
    return jnp.where(_row_is(x.shape, end_rows), 0.0, y)


def _bn_act(z, gamma, beta, relu):
    """Training-mode BatchNorm1d fused with optional ReLU, single-pass statistics.

    `z` is the conv output WITHOUT its bias: under batch-stat normalization the
    per-channel conv bias only shifts the mean and cancels exactly, so it is skipped.
    """
    mean = jnp.mean(z, axis=0, keepdims=True)                  # (1, C)
    ex2 = jnp.mean(z * z, axis=0, keepdims=True)
    var = jnp.maximum(ex2 - mean * mean, 0.0)                  # clamp tiny negatives
    scale = gamma * lax.rsqrt(var + BN_EPS)
    shift = beta - mean * scale
    out = z * scale + shift                                    # one fused scale+shift pass
    return jnp.maximum(out, 0.0) if relu else out


# --------------------------------- Pallas kernel ---------------------------------------
def audio_block_kernel(xe_ref, xo_ref, w_in_ref, g_in_ref, bt_in_ref,
                       res_w_ref, res_g_ref, res_bt_ref,
                       w_out_ref, b_out_ref, o_ref):
    B = BATCH
    L = HP_WAV2VEC_DIM // 2          # per-batch sequence length after conv_in
    N = B * L                        # flat rows = matmul M dimension
    starts = [b * L for b in range(B)]
    ends = [b * L + L - 1 for b in range(B)]

    # ---- conv_in (stride 2), computed only at the kept output positions --------------
    # y[b,o] = x[b,2o-1]@W0 + x[b,2o]@W1 + x[b,2o+1]@W2   (left edge zero-padded)
    xe = xe_ref[...]                                           # (N, D): x[b, 2o]
    xo = xo_ref[...]                                           # (N, D): x[b, 2o+1]
    xm = jnp.concatenate([_shift_down(xo, starts), xe, xo], axis=1)      # (N, 3D) im2col
    z = jnp.dot(xm, w_in_ref[...], preferred_element_type=jnp.float32)   # one MXU push
    h = _bn_act(z, g_in_ref[...], bt_in_ref[...], relu=True)             # (N, C)

    # ---- ResBlocks: each conv = one (N, 3C) @ (3C, C) matmul --------------------------
    res_w = res_w_ref[...]                                     # (2*NR, 3C, C)
    res_g = res_g_ref[...]                                     # (2*NR, C)
    res_bt = res_bt_ref[...]
    for r in range(NUM_RESBLOCKS):                             # static unroll (tiny)
        skip = h
        for j in range(2):
            idx = 2 * r + j
            xm = jnp.concatenate(
                [_shift_down(h, starts), h, _shift_up(h, ends)], axis=1)  # (N, 3C)
            z = jnp.dot(xm, res_w[idx], preferred_element_type=jnp.float32)
            h = _bn_act(z, res_g[idx][None, :], res_bt[idx][None, :], relu=(j == 0))
        h = h + skip

    # ---- conv_out (stride 2) fused with AvgPool1d -------------------------------------
    # mean_o y[b,o] = (1/Lp)[ (sum_{odd,not last} h[b])@W0 + (sum_even h[b])@W1
    #                         + (sum_odd h[b])@W2 ] + b_out
    Lp = L // 2                                                # conv_out output length
    bi = lax.broadcasted_iota(jnp.int32, (B, N), 0)            # output batch index
    rc = lax.broadcasted_iota(jnp.int32, (B, N), 1)            # flat activation row
    in_b = (rc >= bi * L) & (rc < (bi + 1) * L)
    odd = (rc & 1) == 1                                        # local parity (L is even)
    inv = 1.0 / Lp
    a0 = jnp.where(in_b & odd & (rc != (bi + 1) * L - 1), inv, 0.0)   # tap 0: x[2o-1]
    a1 = jnp.where(in_b & jnp.logical_not(odd), inv, 0.0)             # tap 1: x[2o]
    a2 = jnp.where(in_b & odd, inv, 0.0)                              # tap 2: x[2o+1]
    sel = jnp.concatenate([a0, a1, a2], axis=0)                # (3B, N) select+average
    s = jnp.dot(sel, h, preferred_element_type=jnp.float32)    # (3B, C)
    xm = jnp.concatenate([s[0:B, :], s[B:2 * B, :], s[2 * B:3 * B, :]], axis=1)  # (B, 3C)
    pooled = jnp.dot(xm, w_out_ref[...], preferred_element_type=jnp.float32)
    pooled = pooled + b_out_ref[...]                           # (B, C)
    # NOTE: C=32 < 128 lanes -> masked store; widen C (or pack heads) for lane-dense vst.
    o_ref[...] = pooled[:, None, :]                            # (B, 1, C)


# ------------------------------------ wrapper -------------------------------------------
def audio_block(x, params):
    (w_in, b_in, g_in, bt_in, res_w, res_b, res_g, res_bt, w_out, b_out) = params
    del b_in, res_b  # cancel exactly under training-mode BatchNorm (see _bn_act)
    B, T, D = x.shape
    C = HP_COMPUTE_DIM
    Lh = T // 2

    # Wrapper-side layout plumbing only (no compute): de-interleave even/odd time steps
    # for the stride-2 conv_in, fold batch into matmul rows, and fold the 3 conv taps
    # into the contraction dimension of each weight.
    xe = x[:, 0::2, :].reshape(B * Lh, D)
    xo = x[:, 1::2, :].reshape(B * Lh, D)
    w_in_f = w_in.reshape(3 * D, C)
    res_w_f = res_w.reshape(2 * NUM_RESBLOCKS, 3 * C, C)
    w_out_f = w_out.reshape(3 * C, C)

    inputs = (xe, xo, w_in_f, g_in, bt_in, res_w_f, res_g, res_bt, w_out_f, b_out)

    def full_spec(a):
        nd = a.ndim
        return pl.BlockSpec(a.shape, lambda i, nd=nd: (0,) * nd)

    # Single grid step: the whole problem (~tens of KB) fits VMEM on v5e/v6e/v7x.
    # TODO(synk): when B/T scale up, add a "parallel" grid axis over batch/sequence
    # tiles (occupies v7x's 2nd TensorCore) and size tiles against 64 MiB VMEM.
    return pl.pallas_call(
        audio_block_kernel,
        out_shape=jax.ShapeDtypeStruct((B, 1, C), jnp.float32),
        grid=(1,),
        in_specs=[full_spec(a) for a in inputs],
        out_specs=pl.BlockSpec((B, 1, C), lambda i: (0, 0, 0)),
        compiler_params=pltpu.CompilerParams(dimension_semantics=("arbitrary",)),
    )(*inputs)


# ------------------------------ deterministic params ------------------------------------
def init_params(key):
    C, D = HP_COMPUTE_DIM, HP_DIM
    ks = jax.random.split(key, 6)
    w_in = 0.1 * jax.random.normal(ks[0], (3, D, C), jnp.float32)       # taps x Cin x Cout
    b_in = 0.1 * jax.random.normal(ks[1], (1, C), jnp.float32)
    g_in = jnp.ones((1, C), jnp.float32)
    bt_in = jnp.zeros((1, C), jnp.float32)
    res_w = 0.1 * jax.random.normal(ks[2], (2 * NUM_RESBLOCKS, 3, C, C), jnp.float32)
    res_b = 0.1 * jax.random.normal(ks[3], (2 * NUM_RESBLOCKS, C), jnp.float32)
    res_g = jnp.ones((2 * NUM_RESBLOCKS, C), jnp.float32)
    res_bt = jnp.zeros((2 * NUM_RESBLOCKS, C), jnp.float32)
    w_out = 0.1 * jax.random.normal(ks[4], (3, C, C), jnp.float32)
    b_out = 0.1 * jax.random.normal(ks[5], (1, C), jnp.float32)
    return (w_in, b_in, g_in, bt_in, res_w, res_b, res_g, res_bt, w_out, b_out)


# -------------------------- pure-JAX reference (PyTorch semantics) -----------------------
def ref_forward(x, params):
    (w_in, b_in, g_in, bt_in, res_w, res_b, res_g, res_bt, w_out, b_out) = params

    def conv(h, w_kio, b, stride):
        w_oik = jnp.transpose(w_kio, (2, 1, 0))             # (Cout, Cin, 3) like PyTorch
        y = lax.conv_general_dilated(h, w_oik, window_strides=(stride,), padding=[(1, 1)],
                                     dimension_numbers=("NCH", "OIH", "NCH"))
        return y + b.reshape(1, -1, 1)

    def bn(h, g, bt):
        mean = jnp.mean(h, axis=(0, 2), keepdims=True)
        var = jnp.mean((h - mean) ** 2, axis=(0, 2), keepdims=True)
        return (h - mean) / jnp.sqrt(var + BN_EPS) * g.reshape(1, -1, 1) + bt.reshape(1, -1, 1)

    relu = lambda v: jnp.maximum(v, 0.0)
    h = jnp.transpose(x, (0, 2, 1))                         # t.transpose(x, 1, 2) -> NCL
    h = relu(bn(conv(h, w_in, b_in, 2), g_in, bt_in))
    for r in range(NUM_RESBLOCKS):
        skip = h
        h = relu(bn(conv(h, res_w[2 * r], res_b[2 * r], 1), res_g[2 * r], res_bt[2 * r]))
        h = bn(conv(h, res_w[2 * r + 1], res_b[2 * r + 1], 1), res_g[2 * r + 1], res_bt[2 * r + 1])
        h = h + skip
    h = conv(h, w_out, b_out, 2)
    h = jnp.mean(h, axis=2, keepdims=True)                  # AvgPool1d(wav2vec_dim//4)
    return jnp.transpose(h, (0, 2, 1))                      # permute(0,2,1) -> (B, 1, C)


if __name__ == "__main__":
    key = jax.random.PRNGKey(0)
    kx, kp = jax.random.split(key)
    x = jax.random.normal(kx, (BATCH, HP_WAV2VEC_DIM, HP_DIM), jnp.float32)  # (B, T, hp.dim)
    params = init_params(kp)

    out = jax.block_until_ready(audio_block(x, params))
    ref = ref_forward(x, params)

    assert out.shape == (BATCH, 1, HP_COMPUTE_DIM), out.shape
    np.testing.assert_allclose(np.asarray(out), np.asarray(ref), rtol=2e-3, atol=2e-3)
    print("KERNEL_OK")
</pallas_src>

<mosaic_0001>
module attributes {stable_mosaic.version = 11 : i64} {
  func.func @audio_block_kernel(%arg0: i32, %arg1: memref<32x16xf32, #tpu.memory_space<vmem>>, %arg2: memref<32x16xf32, #tpu.memory_space<vmem>>, %arg3: memref<48x32xf32, #tpu.memory_space<vmem>>, %arg4: memref<1x32xf32, #tpu.memory_space<vmem>>, %arg5: memref<1x32xf32, #tpu.memory_space<vmem>>, %arg6: memref<4x96x32xf32, #tpu.memory_space<vmem>>, %arg7: memref<4x32xf32, #tpu.memory_space<vmem>>, %arg8: memref<4x32xf32, #tpu.memory_space<vmem>>, %arg9: memref<96x32xf32, #tpu.memory_space<vmem>>, %arg10: memref<1x32xf32, #tpu.memory_space<vmem>>, %arg11: memref<2x1x32xf32, #tpu.memory_space<vmem>>) attributes {dimension_semantics = [#tpu.dimension_semantics<arbitrary>], iteration_bounds = array<i64: 1>, scalar_prefetch = 0 : i64, scratch_operands = 0 : i64, tpu.core_type = #tpu.core_type<tc>, window_params = [{pipeline_mode = #tpu.pipeline_mode<synchronous>, transform_indices = @transform_0, window_bounds = array<i64: 32, 16>}, {pipeline_mode = #tpu.pipeline_mode<synchronous>, transform_indices = @transform_1, window_bounds = array<i64: 32, 16>}, {pipeline_mode = #tpu.pipeline_mode<synchronous>, transform_indices = @transform_2, window_bounds = array<i64: 48, 32>}, {pipeline_mode = #tpu.pipeline_mode<synchronous>, transform_indices = @transform_3, window_bounds = array<i64: 1, 32>}, {pipeline_mode = #tpu.pipeline_mode<synchronous>, transform_indices = @transform_4, window_bounds = array<i64: 1, 32>}, {pipeline_mode = #tpu.pipeline_mode<synchronous>, transform_indices = @transform_5, window_bounds = array<i64: 4, 96, 32>}, {pipeline_mode = #tpu.pipeline_mode<synchronous>, transform_indices = @transform_6, window_bounds = array<i64: 4, 32>}, {pipeline_mode = #tpu.pipeline_mode<synchronous>, transform_indices = @transform_7, window_bounds = array<i64: 4, 32>}, {pipeline_mode = #tpu.pipeline_mode<synchronous>, transform_indices = @transform_8, window_bounds = array<i64: 96, 32>}, {pipeline_mode = #tpu.pipeline_mode<synchronous>, transform_indices = @transform_9, window_bounds = array<i64: 1, 32>}, {pipeline_mode = #tpu.pipeline_mode<synchronous>, transform_indices = @transform_10, window_bounds = array<i64: 2, 1, 32>}]} {
    %c0 = arith.constant 0 : index
    %c0_0 = arith.constant 0 : index
    %0 = vector.load %arg1[%c0, %c0_0] : memref<32x16xf32, #tpu.memory_space<vmem>>, vector<32x16xf32>
    %c0_1 = arith.constant 0 : index
    %c0_2 = arith.constant 0 : index
    %1 = vector.load %arg2[%c0_1, %c0_2] : memref<32x16xf32, #tpu.memory_space<vmem>>, vector<32x16xf32>
    %cst = arith.constant 0.000000e+00 : f32
    %2 = vector.broadcast %cst : f32 to vector<1x16xf32>
    %3 = vector.extract_strided_slice %1 {offsets = [0, 0], sizes = [31, 16], strides = [1, 1]} : vector<32x16xf32> to vector<31x16xf32>
    %4 = tpu.concatenate %2, %3 in 0 : vector<1x16xf32>, vector<31x16xf32> -> vector<32x16xf32>
    %5 = tpu.iota {dimensions = array<i32: 0>} : vector<32x16xi32>
    %c0_i32 = arith.constant 0 : i32
    %6 = vector.broadcast %c0_i32 : i32 to vector<32x16xi32>
    %7 = arith.cmpi eq, %5, %6 : vector<32x16xi32>
    %c16_i32 = arith.constant 16 : i32
    %8 = vector.broadcast %c16_i32 : i32 to vector<32x16xi32>
    %9 = arith.cmpi eq, %5, %8 : vector<32x16xi32>
    %10 = arith.ori %7, %9 : vector<32x16xi1>
    %cst_3 = arith.constant 0.000000e+00 : f32
    %11 = vector.broadcast %cst_3 : f32 to vector<32x16xf32>
    %12 = arith.select %10, %11, %4 : vector<32x16xi1>, vector<32x16xf32>
    %13 = tpu.concatenate %12, %0, %1 in 1 : vector<32x16xf32>, vector<32x16xf32>, vector<32x16xf32> -> vector<32x48xf32>
    %c0_4 = arith.constant 0 : index
    %c0_5 = arith.constant 0 : index
    %14 = vector.load %arg3[%c0_4, %c0_5] : memref<48x32xf32, #tpu.memory_space<vmem>>, vector<48x32xf32>
    %cst_6 = arith.constant dense<0.000000e+00> : vector<32x32xf32>
    %15 = tpu.matmul %13, %14, %cst_6 {dimension_numbers = #tpu.dot_dimension_numbers<[1], [0], [0], [1], [0, 0, 1, 1], [], []>} : vector<32x48xf32>, vector<48x32xf32>, vector<32x32xf32> -> vector<32x32xf32>
    %c0_7 = arith.constant 0 : index
    %c0_8 = arith.constant 0 : index
    %16 = vector.load %arg4[%c0_7, %c0_8] : memref<1x32xf32, #tpu.memory_space<vmem>>, vector<1x32xf32>
    %c0_9 = arith.constant 0 : index
    %c0_10 = arith.constant 0 : index
    %17 = vector.load %arg5[%c0_9, %c0_10] : memref<1x32xf32, #tpu.memory_space<vmem>>, vector<1x32xf32>
    %cst_11 = arith.constant dense<0.000000e+00> : vector<32xf32>
    %18 = vector.multi_reduction <add>, %15, %cst_11 [0] : vector<32x32xf32> to vector<32xf32>
    %19 = vector.shape_cast %18 : vector<32xf32> to vector<1x32xf32>
    %cst_12 = arith.constant 3.200000e+01 : f32
    %20 = vector.broadcast %cst_12 : f32 to vector<1x32xf32>
    %21 = arith.divf %19, %20 : vector<1x32xf32>
    %22 = arith.mulf %15, %15 : vector<32x32xf32>
    %cst_13 = arith.constant dense<0.000000e+00> : vector<32xf32>
    %23 = vector.multi_reduction <add>, %22, %cst_13 [0] : vector<32x32xf32> to vector<32xf32>
    %24 = vector.shape_cast %23 : vector<32xf32> to vector<1x32xf32>
    %cst_14 = arith.constant 3.200000e+01 : f32
    %25 = vector.broadcast %cst_14 : f32 to vector<1x32xf32>
    %26 = arith.divf %24, %25 : vector<1x32xf32>
    %27 = arith.mulf %21, %21 : vector<1x32xf32>
    %28 = arith.subf %26, %27 : vector<1x32xf32>
    %cst_15 = arith.constant 0.000000e+00 : f32
    %29 = vector.broadcast %cst_15 : f32 to vector<1x32xf32>
    %30 = arith.maximumf %28, %29 : vector<1x32xf32>
    %cst_16 = arith.constant 9.99999974E-6 : f32
    %31 = vector.broadcast %cst_16 : f32 to vector<1x32xf32>
    %32 = arith.addf %30, %31 : vector<1x32xf32>
    %33 = math.rsqrt %32 : vector<1x32xf32>
    %34 = arith.mulf %16, %33 : vector<1x32xf32>
    %35 = arith.mulf %21, %34 : vector<1x32xf32>
    %36 = arith.subf %17, %35 : vector<1x32xf32>
    %37 = vector.broadcast %34 : vector<1x32xf32> to vector<32x32xf32>
    %38 = arith.mulf %15, %37 : vector<32x32xf32>
    %39 = vector.broadcast %36 : vector<1x32xf32> to vector<32x32xf32>
    %40 = arith.addf %38, %39 : vector<32x32xf32>
    %cst_17 = arith.constant 0.000000e+00 : f32
    %41 = vector.broadcast %cst_17 : f32 to vector<32x32xf32>
    %42 = arith.maximumf %40, %41 : vector<32x32xf32>
    %c0_18 = arith.constant 0 : index
    %c0_19 = arith.constant 0 : index
    %c0_20 = arith.constant 0 : index
    %43 = vector.load %arg6[%c0_18, %c0_19, %c0_20] : memref<4x96x32xf32, #tpu.memory_space<vmem>>, vector<4x96x32xf32>
    %c0_21 = arith.constant 0 : index
    %c0_22 = arith.constant 0 : index
    %44 = vector.load %arg7[%c0_21, %c0_22] : memref<4x32xf32, #tpu.memory_space<vmem>>, vector<4x32xf32>
    %c0_23 = arith.constant 0 : index
    %c0_24 = arith.constant 0 : index
    %45 = vector.load %arg8[%c0_23, %c0_24] : memref<4x32xf32, #tpu.memory_space<vmem>>, vector<4x32xf32>
    %cst_25 = arith.constant 0.000000e+00 : f32
    %46 = vector.broadcast %cst_25 : f32 to vector<1x32xf32>
    %47 = vector.extract_strided_slice %42 {offsets = [0, 0], sizes = [31, 32], strides = [1, 1]} : vector<32x32xf32> to vector<31x32xf32>
    %48 = tpu.concatenate %46, %47 in 0 : vector<1x32xf32>, vector<31x32xf32> -> vector<32x32xf32>
    %49 = tpu.iota {dimensions = array<i32: 0>} : vector<32x32xi32>
    %c0_i32_26 = arith.constant 0 : i32
    %50 = vector.broadcast %c0_i32_26 : i32 to vector<32x32xi32>
    %51 = arith.cmpi eq, %49, %50 : vector<32x32xi32>
    %c16_i32_27 = arith.constant 16 : i32
    %52 = vector.broadcast %c16_i32_27 : i32 to vector<32x32xi32>
    %53 = arith.cmpi eq, %49, %52 : vector<32x32xi32>
    %54 = arith.ori %51, %53 : vector<32x32xi1>
    %cst_28 = arith.constant 0.000000e+00 : f32
    %55 = vector.broadcast %cst_28 : f32 to vector<32x32xf32>
    %56 = arith.select %54, %55, %48 : vector<32x32xi1>, vector<32x32xf32>
    %cst_29 = arith.constant 0.000000e+00 : f32
    %57 = vector.broadcast %cst_29 : f32 to vector<1x32xf32>
    %58 = vector.extract_strided_slice %42 {offsets = [1, 0], sizes = [31, 32], strides = [1, 1]} : vector<32x32xf32> to vector<31x32xf32>
    %59 = tpu.concatenate %58, %57 in 0 : vector<31x32xf32>, vector<1x32xf32> -> vector<32x32xf32>
    %60 = tpu.iota {dimensions = array<i32: 0>} : vector<32x32xi32>
    %c15_i32 = arith.constant 15 : i32
    %61 = vector.broadcast %c15_i32 : i32 to vector<32x32xi32>
    %62 = arith.cmpi eq, %60, %61 : vector<32x32xi32>
    %c31_i32 = arith.constant 31 : i32
    %63 = vector.broadcast %c31_i32 : i32 to vector<32x32xi32>
    %64 = arith.cmpi eq, %60, %63 : vector<32x32xi32>
    %65 = arith.ori %62, %64 : vector<32x32xi1>
    %cst_30 = arith.constant 0.000000e+00 : f32
    %66 = vector.broadcast %cst_30 : f32 to vector<32x32xf32>
    %67 = arith.select %65, %66, %59 : vector<32x32xi1>, vector<32x32xf32>
    %68 = tpu.concatenate %56, %42, %67 in 1 : vector<32x32xf32>, vector<32x32xf32>, vector<32x32xf32> -> vector<32x96xf32>
    %69 = vector.extract_strided_slice %43 {offsets = [0, 0, 0], sizes = [1, 96, 32], strides = [1, 1, 1]} : vector<4x96x32xf32> to vector<1x96x32xf32>
    %70 = vector.shape_cast %69 : vector<1x96x32xf32> to vector<96x32xf32>
    %cst_31 = arith.constant dense<0.000000e+00> : vector<32x32xf32>
    %71 = tpu.matmul %68, %70, %cst_31 {dimension_numbers = #tpu.dot_dimension_numbers<[1], [0], [0], [1], [0, 0, 1, 1], [], []>} : vector<32x96xf32>, vector<96x32xf32>, vector<32x32xf32> -> vector<32x32xf32>
    %72 = vector.extract_strided_slice %44 {offsets = [0, 0], sizes = [1, 32], strides = [1, 1]} : vector<4x32xf32> to vector<1x32xf32>
    %73 = vector.shape_cast %72 : vector<1x32xf32> to vector<32xf32>
    %74 = vector.shape_cast %73 : vector<32xf32> to vector<1x32xf32>
    %75 = vector.extract_strided_slice %45 {offsets = [0, 0], sizes = [1, 32], strides = [1, 1]} : vector<4x32xf32> to vector<1x32xf32>
    %76 = vector.shape_cast %75 : vector<1x32xf32> to vector<32xf32>
    %77 = vector.shape_cast %76 : vector<32xf32> to vector<1x32xf32>
    %cst_32 = arith.constant dense<0.000000e+00> : vector<32xf32>
    %78 = vector.multi_reduction <add>, %71, %cst_32 [0] : vector<32x32xf32> to vector<32xf32>
    %79 = vector.shape_cast %78 : vector<32xf32> to vector<1x32xf32>
    %cst_33 = arith.constant 3.200000e+01 : f32
    %80 = vector.broadcast %cst_33 : f32 to vector<1x32xf32>
    %81 = arith.divf %79, %80 : vector<1x32xf32>
    %82 = arith.mulf %71, %71 : vector<32x32xf32>
    %cst_34 = arith.constant dense<0.000000e+00> : vector<32xf32>
    %83 = vector.multi_reduction <add>, %82, %cst_34 [0] : vector<32x32xf32> to vector<32xf32>
    %84 = vector.shape_cast %83 : vector<32xf32> to vector<1x32xf32>
    %cst_35 = arith.constant 3.200000e+01 : f32
    %85 = vector.broadcast %cst_35 : f32 to vector<1x32xf32>
    %86 = arith.divf %84, %85 : vector<1x32xf32>
    %87 = arith.mulf %81, %81 : vector<1x32xf32>
    %88 = arith.subf %86, %87 : vector<1x32xf32>
    %cst_36 = arith.constant 0.000000e+00 : f32
    %89 = vector.broadcast %cst_36 : f32 to vector<1x32xf32>
    %90 = arith.maximumf %88, %89 : vector<1x32xf32>
    %cst_37 = arith.constant 9.99999974E-6 : f32
    %91 = vector.broadcast %cst_37 : f32 to vector<1x32xf32>
    %92 = arith.addf %90, %91 : vector<1x32xf32>
    %93 = math.rsqrt %92 : vector<1x32xf32>
    %94 = arith.mulf %74, %93 : vector<1x32xf32>
    %95 = arith.mulf %81, %94 : vector<1x32xf32>
    %96 = arith.subf %77, %95 : vector<1x32xf32>
    %97 = vector.broadcast %94 : vector<1x32xf32> to vector<32x32xf32>
    %98 = arith.mulf %71, %97 : vector<32x32xf32>
    %99 = vector.broadcast %96 : vector<1x32xf32> to vector<32x32xf32>
    %100 = arith.addf %98, %99 : vector<32x32xf32>
    %cst_38 = arith.constant 0.000000e+00 : f32
    %101 = vector.broadcast %cst_38 : f32 to vector<32x32xf32>
    %102 = arith.maximumf %100, %101 : vector<32x32xf32>
    %cst_39 = arith.constant 0.000000e+00 : f32
    %103 = vector.broadcast %cst_39 : f32 to vector<1x32xf32>
    %104 = vector.extract_strided_slice %102 {offsets = [0, 0], sizes = [31, 32], strides = [1, 1]} : vector<32x32xf32> to vector<31x32xf32>
    %105 = tpu.concatenate %103, %104 in 0 : vector<1x32xf32>, vector<31x32xf32> -> vector<32x32xf32>
    %106 = tpu.iota {dimensions = array<i32: 0>} : vector<32x32xi32>
    %c0_i32_40 = arith.constant 0 : i32
    %107 = vector.broadcast %c0_i32_40 : i32 to vector<32x32xi32>
    %108 = arith.cmpi eq, %106, %107 : vector<32x32xi32>
    %c16_i32_41 = arith.constant 16 : i32
    %109 = vector.broadcast %c16_i32_41 : i32 to vector<32x32xi32>
    %110 = arith.cmpi eq, %106, %109 : vector<32x32xi32>
    %111 = arith.ori %108, %110 : vector<32x32xi1>
    %cst_42 = arith.constant 0.000000e+00 : f32
    %112 = vector.broadcast %cst_42 : f32 to vector<32x32xf32>
    %113 = arith.select %111, %112, %105 : vector<32x32xi1>, vector<32x32xf32>
    %cst_43 = arith.constant 0.000000e+00 : f32
    %114 = vector.broadcast %cst_43 : f32 to vector<1x32xf32>
    %115 = vector.extract_strided_slice %102 {offsets = [1, 0], sizes = [31, 32], strides = [1, 1]} : vector<32x32xf32> to vector<31x32xf32>
    %116 = tpu.concatenate %115, %114 in 0 : vector<31x32xf32>, vector<1x32xf32> -> vector<32x32xf32>
    %117 = tpu.iota {dimensions = array<i32: 0>} : vector<32x32xi32>
    %c15_i32_44 = arith.constant 15 : i32
    %118 = vector.broadcast %c15_i32_44 : i32 to vector<32x32xi32>
    %119 = arith.cmpi eq, %117, %118 : vector<32x32xi32>
    %c31_i32_45 = arith.constant 31 : i32
    %120 = vector.broadcast %c31_i32_45 : i32 to vector<32x32xi32>
    %121 = arith.cmpi eq, %117, %120 : vector<32x32xi32>
    %122 = arith.ori %119, %121 : vector<32x32xi1>
    %cst_46 = arith.constant 0.000000e+00 : f32
    %123 = vector.broadcast %cst_46 : f32 to vector<32x32xf32>
    %124 = arith.select %122, %123, %116 : vector<32x32xi1>, vector<32x32xf32>
    %125 = tpu.concatenate %113, %102, %124 in 1 : vector<32x32xf32>, vector<32x32xf32>, vector<32x32xf32> -> vector<32x96xf32>
    %126 = vector.extract_strided_slice %43 {offsets = [1, 0, 0], sizes = [1, 96, 32], strides = [1, 1, 1]} : vector<4x96x32xf32> to vector<1x96x32xf32>
    %127 = vector.shape_cast %126 : vector<1x96x32xf32> to vector<96x32xf32>
    %cst_47 = arith.constant dense<0.000000e+00> : vector<32x32xf32>
    %128 = tpu.matmul %125, %127, %cst_47 {dimension_numbers = #tpu.dot_dimension_numbers<[1], [0], [0], [1], [0, 0, 1, 1], [], []>} : vector<32x96xf32>, vector<96x32xf32>, vector<32x32xf32> -> vector<32x32xf32>
    %129 = vector.extract_strided_slice %44 {offsets = [1, 0], sizes = [1, 32], strides = [1, 1]} : vector<4x32xf32> to vector<1x32xf32>
    %130 = vector.shape_cast %129 : vector<1x32xf32> to vector<32xf32>
    %131 = vector.shape_cast %130 : vector<32xf32> to vector<1x32xf32>
    %132 = vector.extract_strided_slice %45 {offsets = [1, 0], sizes = [1, 32], strides = [1, 1]} : vector<4x32xf32> to vector<1x32xf32>
    %133 = vector.shape_cast %132 : vector<1x32xf32> to vector<32xf32>
    %134 = vector.shape_cast %133 : vector<32xf32> to vector<1x32xf32>
    %cst_48 = arith.constant dense<0.000000e+00> : vector<32xf32>
    %135 = vector.multi_reduction <add>, %128, %cst_48 [0] : vector<32x32xf32> to vector<32xf32>
    %136 = vector.shape_cast %135 : vector<32xf32> to vector<1x32xf32>
    %cst_49 = arith.constant 3.200000e+01 : f32
    %137 = vector.broadcast %cst_49 : f32 to vector<1x32xf32>
    %138 = arith.divf %136, %137 : vector<1x32xf32>
    %139 = arith.mulf %128, %128 : vector<32x32xf32>
    %cst_50 = arith.constant dense<0.000000e+00> : vector<32xf32>
    %140 = vector.multi_reduction <add>, %139, %cst_50 [0] : vector<32x32xf32> to vector<32xf32>
    %141 = vector.shape_cast %140 : vector<32xf32> to vector<1x32xf32>
    %cst_51 = arith.constant 3.200000e+01 : f32
    %142 = vector.broadcast %cst_51 : f32 to vector<1x32xf32>
    %143 = arith.divf %141, %142 : vector<1x32xf32>
    %144 = arith.mulf %138, %138 : vector<1x32xf32>
    %145 = arith.subf %143, %144 : vector<1x32xf32>
    %cst_52 = arith.constant 0.000000e+00 : f32
    %146 = vector.broadcast %cst_52 : f32 to vector<1x32xf32>
    %147 = arith.maximumf %145, %146 : vector<1x32xf32>
    %cst_53 = arith.constant 9.99999974E-6 : f32
    %148 = vector.broadcast %cst_53 : f32 to vector<1x32xf32>
    %149 = arith.addf %147, %148 : vector<1x32xf32>
    %150 = math.rsqrt %149 : vector<1x32xf32>
    %151 = arith.mulf %131, %150 : vector<1x32xf32>
    %152 = arith.mulf %138, %151 : vector<1x32xf32>
    %153 = arith.subf %134, %152 : vector<1x32xf32>
    %154 = vector.broadcast %151 : vector<1x32xf32> to vector<32x32xf32>
    %155 = arith.mulf %128, %154 : vector<32x32xf32>
    %156 = vector.broadcast %153 : vector<1x32xf32> to vector<32x32xf32>
    %157 = arith.addf %155, %156 : vector<32x32xf32>
    %158 = arith.addf %157, %42 : vector<32x32xf32>
    %cst_54 = arith.constant 0.000000e+00 : f32
    %159 = vector.broadcast %cst_54 : f32 to vector<1x32xf32>
    %160 = vector.extract_strided_slice %158 {offsets = [0, 0], sizes = [31, 32], strides = [1, 1]} : vector<32x32xf32> to vector<31x32xf32>
    %161 = tpu.concatenate %159, %160 in 0 : vector<1x32xf32>, vector<31x32xf32> -> vector<32x32xf32>
    %162 = tpu.iota {dimensions = array<i32: 0>} : vector<32x32xi32>
    %c0_i32_55 = arith.constant 0 : i32
    %163 = vector.broadcast %c0_i32_55 : i32 to vector<32x32xi32>
    %164 = arith.cmpi eq, %162, %163 : vector<32x32xi32>
    %c16_i32_56 = arith.constant 16 : i32
    %165 = vector.broadcast %c16_i32_56 : i32 to vector<32x32xi32>
    %166 = arith.cmpi eq, %162, %165 : vector<32x32xi32>
    %167 = arith.ori %164, %166 : vector<32x32xi1>
    %cst_57 = arith.constant 0.000000e+00 : f32
    %168 = vector.broadcast %cst_57 : f32 to vector<32x32xf32>
    %169 = arith.select %167, %168, %161 : vector<32x32xi1>, vector<32x32xf32>
    %cst_58 = arith.constant 0.000000e+00 : f32
    %170 = vector.broadcast %cst_58 : f32 to vector<1x32xf32>
    %171 = vector.extract_strided_slice %158 {offsets = [1, 0], sizes = [31, 32], strides = [1, 1]} : vector<32x32xf32> to vector<31x32xf32>
    %172 = tpu.concatenate %171, %170 in 0 : vector<31x32xf32>, vector<1x32xf32> -> vector<32x32xf32>
    %173 = tpu.iota {dimensions = array<i32: 0>} : vector<32x32xi32>
    %c15_i32_59 = arith.constant 15 : i32
    %174 = vector.broadcast %c15_i32_59 : i32 to vector<32x32xi32>
    %175 = arith.cmpi eq, %173, %174 : vector<32x32xi32>
    %c31_i32_60 = arith.constant 31 : i32
    %176 = vector.broadcast %c31_i32_60 : i32 to vector<32x32xi32>
    %177 = arith.cmpi eq, %173, %176 : vector<32x32xi32>
    %178 = arith.ori %175, %177 : vector<32x32xi1>
    %cst_61 = arith.constant 0.000000e+00 : f32
    %179 = vector.broadcast %cst_61 : f32 to vector<32x32xf32>
    %180 = arith.select %178, %179, %172 : vector<32x32xi1>, vector<32x32xf32>
    %181 = tpu.concatenate %169, %158, %180 in 1 : vector<32x32xf32>, vector<32x32xf32>, vector<32x32xf32> -> vector<32x96xf32>
    %182 = vector.extract_strided_slice %43 {offsets = [2, 0, 0], sizes = [1, 96, 32], strides = [1, 1, 1]} : vector<4x96x32xf32> to vector<1x96x32xf32>
    %183 = vector.shape_cast %182 : vector<1x96x32xf32> to vector<96x32xf32>
    %cst_62 = arith.constant dense<0.000000e+00> : vector<32x32xf32>
    %184 = tpu.matmul %181, %183, %cst_62 {dimension_numbers = #tpu.dot_dimension_numbers<[1], [0], [0], [1], [0, 0, 1, 1], [], []>} : vector<32x96xf32>, vector<96x32xf32>, vector<32x32xf32> -> vector<32x32xf32>
    %185 = vector.extract_strided_slice %44 {offsets = [2, 0], sizes = [1, 32], strides = [1, 1]} : vector<4x32xf32> to vector<1x32xf32>
    %186 = vector.shape_cast %185 : vector<1x32xf32> to vector<32xf32>
    %187 = vector.shape_cast %186 : vector<32xf32> to vector<1x32xf32>
    %188 = vector.extract_strided_slice %45 {offsets = [2, 0], sizes = [1, 32], strides = [1, 1]} : vector<4x32xf32> to vector<1x32xf32>
    %189 = vector.shape_cast %188 : vector<1x32xf32> to vector<32xf32>
    %190 = vector.shape_cast %189 : vector<32xf32> to vector<1x32xf32>
    %cst_63 = arith.constant dense<0.000000e+00> : vector<32xf32>
    %191 = vector.multi_reduction <add>, %184, %cst_63 [0] : vector<32x32xf32> to vector<32xf32>
    %192 = vector.shape_cast %191 : vector<32xf32> to vector<1x32xf32>
    %cst_64 = arith.constant 3.200000e+01 : f32
    %193 = vector.broadcast %cst_64 : f32 to vector<1x32xf32>
    %194 = arith.divf %192, %193 : vector<1x32xf32>
    %195 = arith.mulf %184, %184 : vector<32x32xf32>
    %cst_65 = arith.constant dense<0.000000e+00> : vector<32xf32>
    %196 = vector.multi_reduction <add>, %195, %cst_65 [0] : vector<32x32xf32> to vector<32xf32>
    %197 = vector.shape_cast %196 : vector<32xf32> to vector<1x32xf32>
    %cst_66 = arith.constant 3.200000e+01 : f32
    %198 = vector.broadcast %cst_66 : f32 to vector<1x32xf32>
    %199 = arith.divf %197, %198 : vector<1x32xf32>
    %200 = arith.mulf %194, %194 : vector<1x32xf32>
    %201 = arith.subf %199, %200 : vector<1x32xf32>
    %cst_67 = arith.constant 0.000000e+00 : f32
    %202 = vector.broadcast %cst_67 : f32 to vector<1x32xf32>
    %203 = arith.maximumf %201, %202 : vector<1x32xf32>
    %cst_68 = arith.constant 9.99999974E-6 : f32
    %204 = vector.broadcast %cst_68 : f32 to vector<1x32xf32>
    %205 = arith.addf %203, %204 : vector<1x32xf32>
    %206 = math.rsqrt %205 : vector<1x32xf32>
    %207 = arith.mulf %187, %206 : vector<1x32xf32>
    %208 = arith.mulf %194, %207 : vector<1x32xf32>
    %209 = arith.subf %190, %208 : vector<1x32xf32>
    %210 = vector.broadcast %207 : vector<1x32xf32> to vector<32x32xf32>
    %211 = arith.mulf %184, %210 : vector<32x32xf32>
    %212 = vector.broadcast %209 : vector<1x32xf32> to vector<32x32xf32>
    %213 = arith.addf %211, %212 : vector<32x32xf32>
    %cst_69 = arith.constant 0.000000e+00 : f32
    %214 = vector.broadcast %cst_69 : f32 to vector<32x32xf32>
    %215 = arith.maximumf %213, %214 : vector<32x32xf32>
    %cst_70 = arith.constant 0.000000e+00 : f32
    %216 = vector.broadcast %cst_70 : f32 to vector<1x32xf32>
    %217 = vector.extract_strided_slice %215 {offsets = [0, 0], sizes = [31, 32], strides = [1, 1]} : vector<32x32xf32> to vector<31x32xf32>
    %218 = tpu.concatenate %216, %217 in 0 : vector<1x32xf32>, vector<31x32xf32> -> vector<32x32xf32>
    %219 = tpu.iota {dimensions = array<i32: 0>} : vector<32x32xi32>
    %c0_i32_71 = arith.constant 0 : i32
    %220 = vector.broadcast %c0_i32_71 : i32 to vector<32x32xi32>
    %221 = arith.cmpi eq, %219, %220 : vector<32x32xi32>
    %c16_i32_72 = arith.constant 16 : i32
    %222 = vector.broadcast %c16_i32_72 : i32 to vector<32x32xi32>
    %223 = arith.cmpi eq, %219, %222 : vector<32x32xi32>
    %224 = arith.ori %221, %223 : vector<32x32xi1>
    %cst_73 = arith.constant 0.000000e+00 : f32
    %225 = vector.broadcast %cst_73 : f32 to vector<32x32xf32>
    %226 = arith.select %224, %225, %218 : vector<32x32xi1>, vector<32x32xf32>
    %cst_74 = arith.constant 0.000000e+00 : f32
    %227 = vector.broadcast %cst_74 : f32 to vector<1x32xf32>
    %228 = vector.extract_strided_slice %215 {offsets = [1, 0], sizes = [31, 32], strides = [1, 1]} : vector<32x32xf32> to vector<31x32xf32>
    %229 = tpu.concatenate %228, %227 in 0 : vector<31x32xf32>, vector<1x32xf32> -> vector<32x32xf32>
    %230 = tpu.iota {dimensions = array<i32: 0>} : vector<32x32xi32>
    %c15_i32_75 = arith.constant 15 : i32
    %231 = vector.broadcast %c15_i32_75 : i32 to vector<32x32xi32>
    %232 = arith.cmpi eq, %230, %231 : vector<32x32xi32>
    %c31_i32_76 = arith.constant 31 : i32
    %233 = vector.broadcast %c31_i32_76 : i32 to vector<32x32xi32>
    %234 = arith.cmpi eq, %230, %233 : vector<32x32xi32>
    %235 = arith.ori %232, %234 : vector<32x32xi1>
    %cst_77 = arith.constant 0.000000e+00 : f32
    %236 = vector.broadcast %cst_77 : f32 to vector<32x32xf32>
    %237 = arith.select %235, %236, %229 : vector<32x32xi1>, vector<32x32xf32>
    %238 = tpu.concatenate %226, %215, %237 in 1 : vector<32x32xf32>, vector<32x32xf32>, vector<32x32xf32> -> vector<32x96xf32>
    %239 = vector.extract_strided_slice %43 {offsets = [3, 0, 0], sizes = [1, 96, 32], strides = [1, 1, 1]} : vector<4x96x32xf32> to vector<1x96x32xf32>
    %240 = vector.shape_cast %239 : vector<1x96x32xf32> to vector<96x32xf32>
    %cst_78 = arith.constant dense<0.000000e+00> : vector<32x32xf32>
    %241 = tpu.matmul %238, %240, %cst_78 {dimension_numbers = #tpu.dot_dimension_numbers<[1], [0], [0], [1], [0, 0, 1, 1], [], []>} : vector<32x96xf32>, vector<96x32xf32>, vector<32x32xf32> -> vector<32x32xf32>
    %242 = vector.extract_strided_slice %44 {offsets = [3, 0], sizes = [1, 32], strides = [1, 1]} : vector<4x32xf32> to vector<1x32xf32>
    %243 = vector.shape_cast %242 : vector<1x32xf32> to vector<32xf32>
    %244 = vector.shape_cast %243 : vector<32xf32> to vector<1x32xf32>
    %245 = vector.extract_strided_slice %45 {offsets = [3, 0], sizes = [1, 32], strides = [1, 1]} : vector<4x32xf32> to vector<1x32xf32>
    %246 = vector.shape_cast %245 : vector<1x32xf32> to vector<32xf32>
    %247 = vector.shape_cast %246 : vector<32xf32> to vector<1x32xf32>
    %cst_79 = arith.constant dense<0.000000e+00> : vector<32xf32>
    %248 = vector.multi_reduction <add>, %241, %cst_79 [0] : vector<32x32xf32> to vector<32xf32>
    %249 = vector.shape_cast %248 : vector<32xf32> to vector<1x32xf32>
    %cst_80 = arith.constant 3.200000e+01 : f32
    %250 = vector.broadcast %cst_80 : f32 to vector<1x32xf32>
    %251 = arith.divf %249, %250 : vector<1x32xf32>
    %252 = arith.mulf %241, %241 : vector<32x32xf32>
    %cst_81 = arith.constant dense<0.000000e+00> : vector<32xf32>
    %253 = vector.multi_reduction <add>, %252, %cst_81 [0] : vector<32x32xf32> to vector<32xf32>
    %254 = vector.shape_cast %253 : vector<32xf32> to vector<1x32xf32>
    %cst_82 = arith.constant 3.200000e+01 : f32
    %255 = vector.broadcast %cst_82 : f32 to vector<1x32xf32>
    %256 = arith.divf %254, %255 : vector<1x32xf32>
    %257 = arith.mulf %251, %251 : vector<1x32xf32>
    %258 = arith.subf %256, %257 : vector<1x32xf32>
    %cst_83 = arith.constant 0.000000e+00 : f32
    %259 = vector.broadcast %cst_83 : f32 to vector<1x32xf32>
    %260 = arith.maximumf %258, %259 : vector<1x32xf32>
    %cst_84 = arith.constant 9.99999974E-6 : f32
    %261 = vector.broadcast %cst_84 : f32 to vector<1x32xf32>
    %262 = arith.addf %260, %261 : vector<1x32xf32>
    %263 = math.rsqrt %262 : vector<1x32xf32>
    %264 = arith.mulf %244, %263 : vector<1x32xf32>
    %265 = arith.mulf %251, %264 : vector<1x32xf32>
    %266 = arith.subf %247, %265 : vector<1x32xf32>
    %267 = vector.broadcast %264 : vector<1x32xf32> to vector<32x32xf32>
    %268 = arith.mulf %241, %267 : vector<32x32xf32>
    %269 = vector.broadcast %266 : vector<1x32xf32> to vector<32x32xf32>
    %270 = arith.addf %268, %269 : vector<32x32xf32>
    %271 = arith.addf %270, %158 : vector<32x32xf32>
    %272 = tpu.iota {dimensions = array<i32: 0>} : vector<2x32xi32>
    %273 = tpu.iota {dimensions = array<i32: 1>} : vector<2x32xi32>
    %c16_i32_85 = arith.constant 16 : i32
    %274 = vector.broadcast %c16_i32_85 : i32 to vector<2x32xi32>
    %275 = arith.muli %272, %274 : vector<2x32xi32>
    %276 = arith.cmpi sge, %273, %275 : vector<2x32xi32>
    %c1_i32 = arith.constant 1 : i32
    %277 = vector.broadcast %c1_i32 : i32 to vector<2x32xi32>
    %278 = arith.addi %272, %277 : vector<2x32xi32>
    %c16_i32_86 = arith.constant 16 : i32
    %279 = vector.broadcast %c16_i32_86 : i32 to vector<2x32xi32>
    %280 = arith.muli %278, %279 : vector<2x32xi32>
    %281 = arith.cmpi slt, %273, %280 : vector<2x32xi32>
    %282 = arith.andi %276, %281 : vector<2x32xi1>
    %c1_i32_87 = arith.constant 1 : i32
    %283 = vector.broadcast %c1_i32_87 : i32 to vector<2x32xi32>
    %284 = arith.andi %273, %283 : vector<2x32xi32>
    %c1_i32_88 = arith.constant 1 : i32
    %285 = vector.broadcast %c1_i32_88 : i32 to vector<2x32xi32>
    %286 = arith.cmpi eq, %284, %285 : vector<2x32xi32>
    %287 = arith.andi %282, %286 : vector<2x32xi1>
    %c1_i32_89 = arith.constant 1 : i32
    %288 = vector.broadcast %c1_i32_89 : i32 to vector<2x32xi32>
    %289 = arith.addi %272, %288 : vector<2x32xi32>
    %c16_i32_90 = arith.constant 16 : i32
    %290 = vector.broadcast %c16_i32_90 : i32 to vector<2x32xi32>
    %291 = arith.muli %289, %290 : vector<2x32xi32>
    %c1_i32_91 = arith.constant 1 : i32
    %292 = vector.broadcast %c1_i32_91 : i32 to vector<2x32xi32>
    %293 = arith.subi %291, %292 : vector<2x32xi32>
    %294 = arith.cmpi ne, %273, %293 : vector<2x32xi32>
    %295 = arith.andi %287, %294 : vector<2x32xi1>
    %cst_92 = arith.constant 1.250000e-01 : f32
    %cst_93 = arith.constant 0.000000e+00 : f32
    %296 = vector.broadcast %cst_92 : f32 to vector<2x32xf32>
    %297 = vector.broadcast %cst_93 : f32 to vector<2x32xf32>
    %298 = arith.select %295, %296, %297 : vector<2x32xi1>, vector<2x32xf32>
    %cst_94 = arith.constant dense<true> : vector<2x32xi1>
    %299 = arith.xori %286, %cst_94 : vector<2x32xi1>
    %300 = arith.andi %282, %299 : vector<2x32xi1>
    %cst_95 = arith.constant 1.250000e-01 : f32
    %cst_96 = arith.constant 0.000000e+00 : f32
    %301 = vector.broadcast %cst_95 : f32 to vector<2x32xf32>
    %302 = vector.broadcast %cst_96 : f32 to vector<2x32xf32>
    %303 = arith.select %300, %301, %302 : vector<2x32xi1>, vector<2x32xf32>
    %304 = arith.andi %282, %286 : vector<2x32xi1>
    %cst_97 = arith.constant 1.250000e-01 : f32
    %cst_98 = arith.constant 0.000000e+00 : f32
    %305 = vector.broadcast %cst_97 : f32 to vector<2x32xf32>
    %306 = vector.broadcast %cst_98 : f32 to vector<2x32xf32>
    %307 = arith.select %304, %305, %306 : vector<2x32xi1>, vector<2x32xf32>
    %308 = tpu.concatenate %298, %303, %307 in 0 : vector<2x32xf32>, vector<2x32xf32>, vector<2x32xf32> -> vector<6x32xf32>
    %cst_99 = arith.constant dense<0.000000e+00> : vector<6x32xf32>
    %309 = tpu.matmul %308, %271, %cst_99 {dimension_numbers = #tpu.dot_dimension_numbers<[1], [0], [0], [1], [0, 0, 1, 1], [], []>} : vector<6x32xf32>, vector<32x32xf32>, vector<6x32xf32> -> vector<6x32xf32>
    %310 = vector.extract_strided_slice %309 {offsets = [0, 0], sizes = [2, 32], strides = [1, 1]} : vector<6x32xf32> to vector<2x32xf32>
    %311 = vector.extract_strided_slice %309 {offsets = [2, 0], sizes = [2, 32], strides = [1, 1]} : vector<6x32xf32> to vector<2x32xf32>
    %312 = vector.extract_strided_slice %309 {offsets = [4, 0], sizes = [2, 32], strides = [1, 1]} : vector<6x32xf32> to vector<2x32xf32>
    %313 = tpu.concatenate %310, %311, %312 in 1 : vector<2x32xf32>, vector<2x32xf32>, vector<2x32xf32> -> vector<2x96xf32>
    %c0_100 = arith.constant 0 : index
    %c0_101 = arith.constant 0 : index
    %314 = vector.load %arg9[%c0_100, %c0_101] : memref<96x32xf32, #tpu.memory_space<vmem>>, vector<96x32xf32>
    %cst_102 = arith.constant dense<0.000000e+00> : vector<2x32xf32>
    %315 = tpu.matmul %313, %314, %cst_102 {dimension_numbers = #tpu.dot_dimension_numbers<[1], [0], [0], [1], [0, 0, 1, 1], [], []>} : vector<2x96xf32>, vector<96x32xf32>, vector<2x32xf32> -> vector<2x32xf32>
    %c0_103 = arith.constant 0 : index
    %c0_104 = arith.constant 0 : index
    %316 = vector.load %arg10[%c0_103, %c0_104] : memref<1x32xf32, #tpu.memory_space<vmem>>, vector<1x32xf32>
    %317 = vector.broadcast %316 : vector<1x32xf32> to vector<2x32xf32>
    %318 = arith.addf %315, %317 : vector<2x32xf32>
    %319 = vector.shape_cast %318 : vector<2x32xf32> to vector<2x1x32xf32>
    %c0_105 = arith.constant 0 : index
    %c0_106 = arith.constant 0 : index
    %c0_107 = arith.constant 0 : index
    %320 = vector.load %arg11[%c0_105, %c0_106, %c0_107] : memref<2x1x32xf32, #tpu.memory_space<vmem>>, vector<2x1x32xf32>
    tpu.vector_store %arg11[%c0_105, %c0_106, %c0_107], %319 {strides = array<i32>} : memref<2x1x32xf32, #tpu.memory_space<vmem>>, vector<2x1x32xf32>,
    return
  }
  func.func @transform_0(%arg0: i32) -> (i32, i32) {
    %c0_i32 = arith.constant 0 : i32
    %c0_i32_0 = arith.constant 0 : i32
    %c0_i32_1 = arith.constant 0 : i32
    return %c0_i32, %c0_i32_0 : i32, i32
  }
  func.func @transform_1(%arg0: i32) -> (i32, i32) {
    %c0_i32 = arith.constant 0 : i32
    %c0_i32_0 = arith.constant 0 : i32
    %c0_i32_1 = arith.constant 0 : i32
    return %c0_i32, %c0_i32_0 : i32, i32
  }
  func.func @transform_2(%arg0: i32) -> (i32, i32) {
    %c0_i32 = arith.constant 0 : i32
    %c0_i32_0 = arith.constant 0 : i32
    %c0_i32_1 = arith.constant 0 : i32
    return %c0_i32, %c0_i32_0 : i32, i32
  }
  func.func @transform_3(%arg0: i32) -> (i32, i32) {
    %c0_i32 = arith.constant 0 : i32
    %c0_i32_0 = arith.constant 0 : i32
    %c0_i32_1 = arith.constant 0 : i32
    return %c0_i32, %c0_i32_0 : i32, i32
  }
  func.func @transform_4(%arg0: i32) -> (i32, i32) {
    %c0_i32 = arith.constant 0 : i32
    %c0_i32_0 = arith.constant 0 : i32
    %c0_i32_1 = arith.constant 0 : i32
    return %c0_i32, %c0_i32_0 : i32, i32
  }
  func.func @transform_5(%arg0: i32) -> (i32, i32, i32) {
    %c0_i32 = arith.constant 0 : i32
    %c0_i32_0 = arith.constant 0 : i32
    %c0_i32_1 = arith.constant 0 : i32
    %c0_i32_2 = arith.constant 0 : i32
    return %c0_i32, %c0_i32_0, %c0_i32_1 : i32, i32, i32
  }
  func.func @transform_6(%arg0: i32) -> (i32, i32) {
    %c0_i32 = arith.constant 0 : i32
    %c0_i32_0 = arith.constant 0 : i32
    %c0_i32_1 = arith.constant 0 : i32
    return %c0_i32, %c0_i32_0 : i32, i32
  }
  func.func @transform_7(%arg0: i32) -> (i32, i32) {
    %c0_i32 = arith.constant 0 : i32
    %c0_i32_0 = arith.constant 0 : i32
    %c0_i32_1 = arith.constant 0 : i32
    return %c0_i32, %c0_i32_0 : i32, i32
  }
  func.func @transform_8(%arg0: i32) -> (i32, i32) {
    %c0_i32 = arith.constant 0 : i32
    %c0_i32_0 = arith.constant 0 : i32
    %c0_i32_1 = arith.constant 0 : i32
    return %c0_i32, %c0_i32_0 : i32, i32
  }
  func.func @transform_9(%arg0: i32) -> (i32, i32) {
    %c0_i32 = arith.constant 0 : i32
    %c0_i32_0 = arith.constant 0 : i32
    %c0_i32_1 = arith.constant 0 : i32
    return %c0_i32, %c0_i32_0 : i32, i32
  }
  func.func @transform_10(%arg0: i32) -> (i32, i32, i32) {
    %c0_i32 = arith.constant 0 : i32
    %c0_i32_0 = arith.constant 0 : i32
    %c0_i32_1 = arith.constant 0 : i32
    %c0_i32_2 = arith.constant 0 : i32
    return %c0_i32, %c0_i32_0, %c0_i32_1 : i32, i32, i32
  }
}

</mosaic_0001>

<bundles_post_ra>
// kernel: tpu_custom_call.1
= control target key start
LH: loop header
LB: loop body
LE: loop exit
PB: predicated region body
PF: predicated region fallthrough
CT: control target
= control target key end

     0   :  { %s1989_s19 = smov 32   ;;  %s1990_s20 = smov 16   ;;  %vm48_vm0 = vcmask 1040384   ;;  %s2646_s0 = inlined_call_operand.vmem [shape: f32[32,16], index: 0, kind: input, shape index: {}]   ;;  %s2647_s1 = inlined_call_operand.vmem [shape: f32[32,16], index: 1, kind: input, shape index: {}]   ;;  %s2648_s2 = inlined_call_operand.vmem [shape: f32[48,32], index: 2, kind: input, shape index: {}]   ;;  %s2649_s3 = inlined_call_operand.vmem [shape: f32[1,32], index: 3, kind: input, shape index: {}]   ;;  %s2650_s4 = inlined_call_operand.vmem [shape: f32[1,32], index: 4, kind: input, shape index: {}]   ;;  %s2651_s5 = inlined_call_operand.vmem [shape: f32[4,96,32], index: 5, kind: input, shape index: {}]   ;;  %s2652_s6 = inlined_call_operand.vmem [shape: f32[4,32], index: 6, kind: input, shape index: {}]   ;;  %s2653_s7 = inlined_call_operand.vmem [shape: f32[4,32], index: 7, kind: input, shape index: {}]   ;;  %s2654_s8 = inlined_call_operand.vmem [shape: f32[96,32], index: 8, kind: input, shape index: {}]   ;;  %s2655_s9 = inlined_call_operand.vmem [shape: f32[1,32], index: 9, kind: input, shape index: {}]   ;;  %s2656_s10 = inlined_call_operand.hbm [shape: f32[2,1,32], index: 10, kind: output, shape index: {}]  }
   0x1   :  { %v40_v0 = vld [vmem:[%s2647_s1] sm:$0xff]  ;;  %v41_v2 = vld [vmem:[%s2647_s1 + $0x8] sm:$0xff]  ;;  %v43_v6 = vld [vmem:[%s2647_s1 + $0x18] sm:$0xff] }
   0x2   :  { %v36_v1 = vld [vmem:[%s2646_s0] sm:$0xff]  ;;  %98 = vrot.lane.b32.xlu1 %v40_v0, %s1989_s19  ;;  %v49_v3 = vrot.slane %v40_v0, 7  ;;  %v50_v4 = vrot.slane %v41_v2, 7  ;;  %v37_v5 = vld [vmem:[%s2646_s0 + $0x8] sm:$0xff]  ;;  %v42_v7 = vld [vmem:[%s2647_s1 + $0x10] sm:$0xff]  ;;  %v54_v8 = vrot.slane %v43_v6, 7 }
   0x3   :  { %86 = vrot.lane.b32.xlu0 %v36_v1, %s1990_s20  ;;  %v52_v9 = vrot.slane %v42_v7, 7  ;;  %v120_v10 = vld [vmem:[%s2648_s2] sm:$0xff]  ;;  %v121_v11 = vld [vmem:[%s2648_s2 + $0x8] sm:$0xff]  ;;  %v122_v12 = vld [vmem:[%s2648_s2 + $0x10] sm:$0xff] }
   0x4   :  { %v51_v13 = vsel %vm48_vm0, %v49_v3, %v50_v4  ;;  %v1813_v14 = vpack.c.bf16 %v121_v11, %v120_v10  ;;  %v123_v15 = vld [vmem:[%s2648_s2 + $0x18] sm:$0xff]  ;;  %v124_v16 = vld [vmem:[%s2648_s2 + $0x20] sm:$0xff]  ;;  %v125_v18 = vld [vmem:[%s2648_s2 + $0x28] sm:$0xff] }
   0x5   :  { %v1817_v17 = vpack.c.bf16 %v123_v15, %v122_v12  ;;  %v55_v19 = vsel %vm48_vm0, %v52_v9, %v54_v8 }
   0x6   :  { %100 = vrot.lane.b32.xlu1 %v41_v2, %s1989_s19 }
   0x7   :  { %88 = vrot.lane.b32.xlu0 %v37_v5, %s1990_s20 }
   0x8   :  { %15 = vsyncpa [#allocation3], 0  ;;  %v39_v20 = vld [vmem:[%s2646_s0 + $0x18] sm:$0xff]  ;;  %v38_v21 = vld [vmem:[%s2646_s0 + $0x10] sm:$0xff]  ;;  %1814 = vmatprep.subr.bf16.mxu0 %v1813_v14  ;;  %v53_v22 = vsel %vm48_vm0, %v50_v4, %v52_v9  ;;  %v1821_v23 = vpack.c.bf16 %v125_v18, %v124_v16  ;;  %v61_v24 = vlaneseq  ;;  %v60_v26 = vsel %vm48_vm0, 0.0, %v49_v3 }
   0x9   :  { %1816 = vmatpush3.bf16.msra.mxu0 %v1813_v14  ;;  %vm110_vm2 = vcmask 130048   ;;  %vm115_vm3 = vcmask 261120   ;;  %vm126_vm4 = vcmask 392192   ;;  %v291_v46 = vld [vmem:[%s2651_s5] sm:$0xff]  ;;  %v292_v47 = vld [vmem:[%s2651_s5 + $0x8] sm:$0xff]  ;;  %v293_v48 = vld [vmem:[%s2651_s5 + $0x10] sm:$0xff] }
   0xa   :  { %1818 = vmatprep.subr.bf16.mxu0 %v1817_v17  ;;  %92 = vrot.lane.b32.xlu1 %v39_v20, %s1990_s20  ;;  %v2108_v25 = vshrl.u32 %v61_v24, 7  ;;  %v1825_v49 = vpack.c.bf16 %v292_v47, %v291_v46  ;;  %v294_v50 = vld [vmem:[%s2651_s5 + $0x18] sm:$0xff]  ;;  %v295_v52 = vld [vmem:[%s2651_s5 + $0x20] sm:$0xff]  ;;  %v296_v53 = vld [vmem:[%s2651_s5 + $0x28] sm:$0xff]  ;;  %vm361_vm6 = vcmask 1046528   ;;  %vm422_vm9 = vcmask 523264  }
   0xb   :  { %90 = vrot.lane.b32.xlu0 %v38_v21, %s1990_s20  ;;  %v1829_v51 = vpack.c.bf16 %v294_v50, %v293_v48  ;;  %v1833_v54 = vpack.c.bf16 %v296_v53, %v295_v52  ;;  %v297_v55 = vld [vmem:[%s2651_s5 + $0x30] sm:$0xff]  ;;  %v298_v56 = vld [vmem:[%s2651_s5 + $0x38] sm:$0xff]  ;;  %vm427_vm10 = vcmask 785408   ;;  %vm1993_vm11 = vmmov 0  }
   0xc   :  { %vm66_vm1 = vcmp.eq.s32.totalorder %v2108_v25, 0  ;;  %v2117_v32 = vadd.s32 16, %v2108_v25  ;;  %1826 = vmatprep.subr.bf16.mxu1 %v1825_v49  ;;  %v1837_v57 = vpack.c.bf16 %v298_v56, %v297_v55  ;;  %v301_v47 = vld [vmem:[%s2651_s5 + $0x50] sm:$0xff]  ;;  %v302_v48 = vld [vmem:[%s2651_s5 + $0x58] sm:$0xff] }
   0xd   :  { %1820 = vmatpush3.bf16.msra.mxu0 %v1817_v17  ;;  %v78_v27 = vsel %vm66_vm1, 0.0, %v60_v26  ;;  %1828 = vmatpush3.bf16.msra.mxu1 %v1825_v49 }
   0xe   :  { %1822 = vmatprep.subr.bf16.mxu0 %v1821_v23  ;;  %104 = vrot.lane.b32.xlu1 %v43_v6, %s1989_s19  ;;  %vm72_vm5 = vcmp.eq.s32.totalorder %v2117_v32, 16  ;;  %v1994_v32 = vmov 0.0  }
   0xf   :  { %102 = vrot.lane.b32.xlu0 %v42_v7, %s1989_s19  ;;  %v80_v39 = vsel %vm72_vm5, 0.0, %v53_v22  ;;  %1830 = vmatprep.subr.bf16.mxu1 %v1829_v51 }
  0x11   :  { %1824 = vmatpush3.bf16.msra.mxu0 %v1821_v23  ;;  %1832 = vmatpush3.bf16.msra.mxu1 %v1829_v51 }
  0x12   :  { %1834 = vmatprep.subr.bf16.mxu1 %v1833_v54 }
  0x15   :  { %1836 = vmatpush3.bf16.msra.mxu1 %v1833_v54  ;;  %v1845_v54 = vpack.c.bf16 %v302_v48, %v301_v47  ;;  %v307_v48 = vld [vmem:[%s2651_s5 + $0x80] sm:$0xff] }
  0x16   :  { %1838 = vmatprep.subr.bf16.mxu1 %v1837_v57 }
  0x19   :  { %1840 = vmatpush3.bf16.msra.mxu1 %v1837_v57 }
  0x74   :  { %v99_v28 = vpop.permute.xlu1 %98 }
  0x75   :  { %v87_v29 = vpop.permute.xlu0 %86 }
  0x76   :  { %v111_v30 = vsel %vm110_vm2, %v78_v27, %v87_v29 }
  0x77   :  { %v116_v31 = vsel %vm115_vm3, %v111_v30, %v99_v28 }
  0x78   :  { %1649 = vmatprep.mubr.msk.f32.mxu0 %vm126_vm4, %v116_v31  ;;  %v101_v33 = vpop.permute.xlu1 %100 }
  0x79   :  { %v89_v34 = vpop.permute.xlu0 %88 }
  0x7a   :  { %v112_v35 = vsel %vm110_vm2, %v51_v13, %v89_v34 }
  0x7b   :  { %v117_v36 = vsel %vm115_vm3, %v112_v35, %v101_v33 }
  0x7c   :  { %1650 = vmatmul.mubr.msk.f32.vlgmr.msra.gmra.mrb[0].mxu0 %vm126_vm4, %v117_v36  ;;  %v93_v37 = vpop.permute.xlu1 %92 }
  0x7d   :  { %v91_v38 = vpop.permute.xlu0 %90  ;;  %v114_v40 = vsel %vm110_vm2, %v55_v19, %v93_v37  ;;  %v224_v37 = vld [vmem:[%s2649_s3] sm:$0x1] }
  0x7e   :  { %v113_v41 = vsel %vm110_vm2, %v80_v39, %v91_v38  ;;  %v2168_v38 = vsub.s32 0, %v2108_v25 }
  0x80   :  { %v105_v42 = vpop.permute.xlu1 %104 }
  0x81   :  { %v103_v43 = vpop.permute.xlu0 %102  ;;  %v119_v44 = vsel %vm115_vm3, %v114_v40, %v105_v42  ;;  %v299_v40 = vld [vmem:[%s2651_s5 + $0x40] sm:$0xff] }
  0x82   :  { %v118_v45 = vsel %vm115_vm3, %v113_v41, %v103_v43  ;;  %v300_v41 = vld [vmem:[%s2651_s5 + $0x48] sm:$0xff] }
  0x83   :  { %1652 = vmatprep.mubr.msk.f32.mxu0 %vm126_vm4, %v118_v45  ;;  %v1841_v43 = vpack.c.bf16 %v300_v41, %v299_v40 }
  0x84   :  { %1653 = vmatmul.mubr.msk.f32.gmra.mrb[2].mxu0 %vm126_vm4, %v119_v44  ;;  %v225_v44 = vld [vmem:[%s2650_s4] sm:$0x1]  ;;  %s1991_s4 = smov 64  }
  0x85   :  { %1842 = vmatprep.subr.bf16.mxu1 %v1841_v43 }
  0x86   :  { %1844 = vmatpush3.bf16.msra.mxu1 %v1841_v43  ;;  %v304_v43 = vld [vmem:[%s2651_s5 + $0x68] sm:$0xff] }
  0x87   :  { %1846 = vmatprep.subr.bf16.mxu1 %v1845_v54 }
  0x8a   :  { %1848 = vmatpush3.bf16.msra.mxu1 %v1845_v54 }
 0x14f   :  { %v1651_v58 = vpop.f32.mrb[0].mxu0 }
 0x150   :  { %v227_v59 = vsel %vm115_vm3, %v1651_v58, 0.0  ;;  %v242_v60 = vmul.f32 %v1651_v58, %v1651_v58  ;;  %v205_v61 = vpop.f32.mrb[1].mxu0 }
 0x151   :  { %v226_v62 = vsel %vm115_vm3, %v205_v61, 0.0  ;;  %v241_v63 = vmul.f32 %v205_v61, %v205_v61 }
 0x152   :  { %v246_v0 = vsel %vm115_vm3, %v242_v60, 0.0  ;;  %v228_v1 = vadd.f32 %v227_v59, %v226_v62 }
 0x153   :  { %v245_v2 = vsel %vm115_vm3, %v241_v63, 0.0 }
 0x154   :  { %v247_v3 = vadd.f32 %v246_v0, %v245_v2 }
 0x157   :  { %v1654_v4 = vpop.f32.mrb[2].mxu0 }
 0x158   :  { %v215_v5 = vpop.f32.mrb[3].mxu0  ;;  %v244_v6 = vmul.f32 %v1654_v4, %v1654_v4  ;;  %v231_v10 = vsel %vm115_vm3, %v1654_v4, 0.0 }
 0x159   :  { %v229_v7 = vsel %vm115_vm3, %v215_v5, 0.0  ;;  %v243_v8 = vmul.f32 %v215_v5, %v215_v5 }
 0x15a   :  { %v230_v9 = vadd.f32 %v229_v7, %v228_v1  ;;  %v250_v14 = vsel %vm115_vm3, %v244_v6, 0.0 }
 0x15b   :  { %v248_v11 = vsel %vm115_vm3, %v243_v8, 0.0 }
 0x15c   :  { %v232_v12 = vadd.f32 %v231_v10, %v230_v9  ;;  %v249_v13 = vadd.f32 %v248_v11, %v247_v3 }
 0x15e   :  { %v233_v15 = vrot.slane %v232_v12, 4  ;;  %v251_v16 = vadd.f32 %v250_v14, %v249_v13 }
 0x160   :  { %v234_v17 = vadd.f32 %v233_v15, %v232_v12  ;;  %v252_v18 = vrot.slane %v251_v16, 4 }
 0x162   :  { %v235_v19 = vrot.slane %v234_v17, 2  ;;  %v253_v20 = vadd.f32 %v252_v18, %v251_v16 }
 0x164   :  { %v236_v21 = vadd.f32 %v235_v19, %v234_v17  ;;  %v254_v22 = vrot.slane %v253_v20, 2 }
 0x166   :  { %v237_v23 = vrot.slane %v236_v21, 1  ;;  %v255_v26 = vadd.f32 %v254_v22, %v253_v20 }
 0x168   :  { %v238_v27 = vadd.f32 %v237_v23, %v236_v21  ;;  %v256_v28 = vrot.slane %v255_v26, 1 }
 0x16a   :  { %v240_v29 = vmul.f32 0.03125, %v238_v27  ;;  %v257_v30 = vadd.f32 %v256_v28, %v255_v26 }
 0x16c   :  { %v258_v31 = vmul.f32 0.03125, %v257_v30  ;;  %v259_v33 = vmul.f32 %v240_v29, %v240_v29 }
 0x16e   :  { %v260_v34 = vsub.f32 %v258_v31, %v259_v33 }
 0x170   :  { %v261_v35 = vmax.f32 %v260_v34, 0.0 }
 0x172   :  { %v262_v36 = vadd.f32 1e-05, %v261_v35 }
 0x174   :  { %1955 = vrsqrt.f32 %v262_v36 }
 0x17e   :  { %v1956_v39 = vpop.eup %1955 }
 0x17f   :  { %v264_v42 = vmul.f32 %v1956_v39, %v224_v37 }
 0x181   :  { %v265_v45 = vmul.f32 %v264_v42, %v240_v29  ;;  %v271_v46 = vrot.slane %v264_v42, %v2168_v38  ;;  %v303_v42 = vld [vmem:[%s2651_s5 + $0x60] sm:$0xff] }
 0x183   :  { %v266_v49 = vsub.f32 %v225_v44, %v265_v45  ;;  %v275_v50 = vmul.f32 %v271_v46, %v215_v5  ;;  %v274_v51 = vmul.f32 %v1651_v58, %v271_v46  ;;  %v273_v52 = vmul.f32 %v271_v46, %v205_v61  ;;  %v305_v44 = vld [vmem:[%s2651_s5 + $0x70] sm:$0xff] }
 0x184   :  { %v276_v53 = vmul.f32 %v1654_v4, %v271_v46  ;;  %v2200_v61 = vadd.s32 8, %v2108_v25  ;;  %v2212_v5 = vadd.s32 24, %v2108_v25  ;;  %v1849_v45 = vpack.c.bf16 %v304_v43, %v303_v42  ;;  %v306_v46 = vld [vmem:[%s2651_s5 + $0x78] sm:$0xff]  ;;  %v311_v42 = vld [vmem:[%s2651_s5 + $0xa0] sm:$0xff]  ;;  %v312_v43 = vld [vmem:[%s2651_s5 + $0xa8] sm:$0xff] }
 0x185   :  { %v281_v55 = vrot.slane %v266_v49, %v2168_v38  ;;  %v1853_v47 = vpack.c.bf16 %v306_v46, %v305_v44  ;;  %v308_v49 = vld [vmem:[%s2651_s5 + $0x88] sm:$0xff]  ;;  %v2298_v46 = vld [vmem:[%s2653_s7] sm:$0xf] }
 0x186   :  { %vm375_vm7 = vcmp.eq.s32.totalorder %v2200_v61, 15  ;;  %vm381_vm8 = vcmp.eq.s32.totalorder %v2212_v5, 31  ;;  %1850 = vmatprep.subr.bf16.mxu0 %v1849_v45 }
 0x187   :  { %v285_v56 = vadd.f32 %v281_v55, %v275_v50  ;;  %v284_v57 = vadd.f32 %v281_v55, %v274_v51  ;;  %v283_v59 = vadd.f32 %v281_v55, %v273_v52  ;;  %v286_v60 = vadd.f32 %v281_v55, %v276_v53  ;;  %1852 = vmatpush3.bf16.msra.mxu0 %v1849_v45  ;;  %v309_v51 = vld [vmem:[%s2651_s5 + $0x90] sm:$0xff]  ;;  %v310_v52 = vld [vmem:[%s2651_s5 + $0x98] sm:$0xff] }
 0x188   :  { %1854 = vmatprep.subr.bf16.mxu0 %v1853_v47  ;;  %v1857_v50 = vpack.c.bf16 %v308_v49, %v307_v48  ;;  %v1861_v53 = vpack.c.bf16 %v310_v52, %v309_v51  ;;  %v1865_v45 = vpack.c.bf16 %v312_v43, %v311_v42  ;;  %v313_v49 = vld [vmem:[%s2651_s5 + $0xb0] sm:$0xff] }
 0x189   :  { %v2187_v62 = vmax.f32 %v285_v56, 0.0  ;;  %v2189_v63 = vmax.f32 %v284_v57, 0.0  ;;  %v2191_v0 = vmax.f32 %v283_v59, 0.0  ;;  %v2197_v58 = vmax.f32 %v286_v60, 0.0 }
 0x18b   :  { %392 = vrot.lane.b32.xlu1 %v2189_v63, %s1989_s19  ;;  %390 = vrot.lane.b32.xlu0 %v2191_v0, %s1989_s19  ;;  %v363_v1 = vrot.slane %v2189_v63, 1  ;;  %v365_v2 = vrot.slane %v2187_v62, 1  ;;  %v362_v3 = vrot.slane %v2191_v0, 1  ;;  %v367_v6 = vrot.slane %v2197_v58, 1 }
 0x18c   :  { %v345_v13 = vrot.slane %v2191_v0, 7  ;;  %v346_v15 = vrot.slane %v2189_v63, 7  ;;  %v348_v17 = vrot.slane %v2187_v62, 7  ;;  %v350_v22 = vrot.slane %v2197_v58, 7  ;;  %1856 = vmatpush3.bf16.msra.mxu0 %v1853_v47 }
 0x18d   :  { %v366_v4 = vsel %vm361_vm6, %v363_v1, %v365_v2  ;;  %v364_v8 = vsel %vm361_vm6, %v362_v3, %v363_v1  ;;  %v373_v9 = vsel %vm361_vm6, %v367_v6, 0.0  ;;  %v368_v11 = vsel %vm361_vm6, %v365_v2, %v367_v6  ;;  %1858 = vmatprep.subr.bf16.mxu0 %v1857_v50 }
 0x18e   :  { %v387_v7 = vsel %vm375_vm7, 0.0, %v366_v4  ;;  %v389_v10 = vsel %vm381_vm8, 0.0, %v373_v9  ;;  %v356_v16 = vsel %vm48_vm0, 0.0, %v345_v13  ;;  %v347_v20 = vsel %vm48_vm0, %v345_v13, %v346_v15 }
 0x18f   :  { %396 = vrot.lane.b32.xlu1 %v2197_v58, %s1989_s19  ;;  %394 = vrot.lane.b32.xlu0 %v2187_v62, %s1989_s19  ;;  %v357_v21 = vsel %vm66_vm1, 0.0, %v356_v16  ;;  %v349_v27 = vsel %vm48_vm0, %v346_v15, %v348_v17  ;;  %v351_v33 = vsel %vm48_vm0, %v348_v17, %v350_v22 }
 0x190   :  { %v359_v34 = vsel %vm72_vm5, 0.0, %v349_v27  ;;  %1860 = vmatpush3.bf16.msra.mxu0 %v1857_v50  ;;  %v314_v50 = vld [vmem:[%s2651_s5 + $0xb8] sm:$0xff] }
 0x191   :  { %1862 = vmatprep.subr.bf16.mxu0 %v1861_v53 }
 0x193   :  { %408 = vrot.lane.b32.xlu1 %v387_v7, %s1991_s4  ;;  %406 = vrot.lane.b32.xlu0 %v364_v8, %s1991_s4 }
 0x194   :  { %1864 = vmatpush3.bf16.msra.mxu0 %v1861_v53 }
 0x195   :  { %1866 = vmatprep.subr.bf16.mxu0 %v1865_v45 }
 0x197   :  { %412 = vrot.lane.b32.xlu1 %v389_v10, %s1991_s4  ;;  %410 = vrot.lane.b32.xlu0 %v368_v11, %s1991_s4 }
 0x198   :  { %1868 = vmatpush3.bf16.msra.mxu0 %v1865_v45 }
 0x1fd   :  { %v393_v12 = vpop.permute.xlu1 %392  ;;  %v391_v14 = vpop.permute.xlu0 %390 }
 0x1fe   :  { %v419_v23 = vsel %vm115_vm3, %v347_v20, %v393_v12  ;;  %v418_v26 = vsel %vm115_vm3, %v357_v21, %v391_v14 }
 0x201   :  { %v397_v18 = vpop.permute.xlu1 %396  ;;  %v395_v19 = vpop.permute.xlu0 %394 }
 0x202   :  { %v421_v35 = vsel %vm115_vm3, %v351_v33, %v397_v18  ;;  %v420_v36 = vsel %vm115_vm3, %v359_v34, %v395_v19 }
 0x205   :  { %v409_v28 = vpop.permute.xlu1 %408  ;;  %v407_v29 = vpop.permute.xlu0 %406 }
 0x206   :  { %v424_v30 = vsel %vm422_vm9, %v419_v23, %v409_v28  ;;  %v423_v31 = vsel %vm422_vm9, %v418_v26, %v407_v29 }
 0x207   :  { %1679 = vmatprep.mubr.msk.f32.mxu1 %vm427_vm10, %v423_v31 }
 0x208   :  { %1680 = vmatmul.mubr.msk.f32.vlgmr.msra.gmra.mrb[0].mxu1 %vm427_vm10, %v424_v30 }
 0x209   :  { %v413_v37 = vpop.permute.xlu1 %412  ;;  %v411_v39 = vpop.permute.xlu0 %410 }
 0x20a   :  { %v426_v40 = vsel %vm422_vm9, %v421_v35, %v413_v37  ;;  %v425_v41 = vsel %vm422_vm9, %v420_v36, %v411_v39 }
 0x20b   :  { %1682 = vmatprep.mubr.msk.f32.mxu1 %vm427_vm10, %v425_v41 }
 0x20c   :  { %1683 = vmatmul.mubr.msk.f32.gmra.mrb[2].mxu1 %vm427_vm10, %v426_v40  ;;  %v2286_v40 = vld [vmem:[%s2652_s6] sm:$0xf] }
 0x2db   :  { %v1681_v54 = vpop.f32.mrb[0].mxu1 }
 0x2dc   :  { %v526_v55 = vsel %vm115_vm3, %v1681_v54, 0.0  ;;  %v540_v56 = vmul.f32 %v1681_v54, %v1681_v54  ;;  %v506_v57 = vpop.f32.mrb[1].mxu1 }
 0x2dd   :  { %v525_v59 = vsel %vm115_vm3, %v506_v57, 0.0  ;;  %v539_v60 = vmul.f32 %v506_v57, %v506_v57 }
 0x2de   :  { %v544_v1 = vsel %vm115_vm3, %v540_v56, 0.0  ;;  %v527_v2 = vadd.f32 %v526_v55, %v525_v59  ;;  %v1869_v59 = vpack.c.bf16 %v314_v50, %v313_v49  ;;  %v315_v49 = vld [vmem:[%s2651_s5 + $0xc0] sm:$0xff]  ;;  %v316_v50 = vld [vmem:[%s2651_s5 + $0xc8] sm:$0xff] }
 0x2df   :  { %v543_v3 = vsel %vm115_vm3, %v539_v60, 0.0  ;;  %v1684_v4 = vpop.f32.mrb[2].mxu1 }
 0x2e0   :  { %v545_v6 = vadd.f32 %v544_v1, %v543_v3  ;;  %v516_v7 = vpop.f32.mrb[3].mxu1  ;;  %v542_v8 = vmul.f32 %v1684_v4, %v1684_v4  ;;  %v530_v12 = vsel %vm115_vm3, %v1684_v4, 0.0  ;;  %1870 = vmatprep.subr.bf16.mxu0 %v1869_v59 }
 0x2e1   :  { %v528_v9 = vsel %vm115_vm3, %v516_v7, 0.0  ;;  %v541_v10 = vmul.f32 %v516_v7, %v516_v7  ;;  %1872 = vmatpush3.bf16.msra.mxu0 %v1869_v59  ;;  %v320_v59 = vld [vmem:[%s2651_s5 + $0xe8] sm:$0xff] }
 0x2e2   :  { %v529_v11 = vadd.f32 %v528_v9, %v527_v2  ;;  %v548_v16 = vsel %vm115_vm3, %v542_v8, 0.0 }
 0x2e3   :  { %v546_v13 = vsel %vm115_vm3, %v541_v10, 0.0 }
 0x2e4   :  { %v531_v14 = vadd.f32 %v530_v12, %v529_v11  ;;  %v547_v15 = vadd.f32 %v546_v13, %v545_v6 }
 0x2e6   :  { %v532_v17 = vrot.slane %v531_v14, 4  ;;  %v549_v18 = vadd.f32 %v548_v16, %v547_v15 }
 0x2e8   :  { %v533_v19 = vadd.f32 %v532_v17, %v531_v14  ;;  %v550_v20 = vrot.slane %v549_v18, 4 }
 0x2ea   :  { %v534_v21 = vrot.slane %v533_v19, 2  ;;  %v551_v22 = vadd.f32 %v550_v20, %v549_v18 }
 0x2ec   :  { %v535_v23 = vadd.f32 %v534_v21, %v533_v19  ;;  %v552_v26 = vrot.slane %v551_v22, 2 }
 0x2ee   :  { %v536_v27 = vrot.slane %v535_v23, 1  ;;  %v553_v28 = vadd.f32 %v552_v26, %v551_v22 }
 0x2f0   :  { %v537_v29 = vadd.f32 %v536_v27, %v535_v23  ;;  %v554_v30 = vrot.slane %v553_v28, 1 }
 0x2f2   :  { %v538_v31 = vmul.f32 0.03125, %v537_v29  ;;  %v555_v33 = vadd.f32 %v554_v30, %v553_v28 }
 0x2f4   :  { %v556_v34 = vmul.f32 0.03125, %v555_v33  ;;  %v557_v35 = vmul.f32 %v538_v31, %v538_v31 }
 0x2f6   :  { %v558_v36 = vsub.f32 %v556_v34, %v557_v35 }
 0x2f8   :  { %v559_v37 = vmax.f32 %v558_v36, 0.0 }
 0x2fa   :  { %v560_v39 = vadd.f32 1e-05, %v559_v37 }
 0x2fc   :  { %1957 = vrsqrt.f32 %v560_v39 }
 0x306   :  { %v1958_v41 = vpop.eup %1957 }
 0x307   :  { %v562_v44 = vmul.f32 %v1958_v41, %v2286_v40 }
 0x309   :  { %v563_v47 = vmul.f32 %v562_v44, %v538_v31  ;;  %v568_v48 = vrot.slane %v562_v44, %v2168_v38 }
 0x30b   :  { %v571_v51 = vmul.f32 %v568_v48, %v516_v7  ;;  %v564_v52 = vsub.f32 %v2298_v46, %v563_v47  ;;  %v570_v53 = vmul.f32 %v1681_v54, %v568_v48  ;;  %v569_v55 = vmul.f32 %v568_v48, %v506_v57 }
 0x30c   :  { %v572_v56 = vmul.f32 %v1684_v4, %v568_v48 }
 0x30d   :  { %v576_v60 = vrot.slane %v564_v52, %v2168_v38  ;;  %v1873_v52 = vpack.c.bf16 %v316_v50, %v315_v49  ;;  %v323_v50 = vld [vmem:[%s2651_s5 + $0x100] sm:$0xff] }
 0x30f   :  { %v578_v1 = vadd.f32 %v576_v60, %v570_v53  ;;  %v577_v2 = vadd.f32 %v576_v60, %v569_v55  ;;  %v580_v3 = vadd.f32 %v576_v60, %v572_v56  ;;  %v579_v6 = vadd.f32 %v576_v60, %v571_v51  ;;  %v317_v51 = vld [vmem:[%s2651_s5 + $0xd0] sm:$0xff]  ;;  %v318_v53 = vld [vmem:[%s2651_s5 + $0xd8] sm:$0xff]  ;;  %v319_v56 = vld [vmem:[%s2651_s5 + $0xe0] sm:$0xff]  ;;  %1874 = vmatprep.subr.bf16.mxu1 %v1873_v52 }
 0x310   :  { %v1877_v55 = vpack.c.bf16 %v318_v53, %v317_v51  ;;  %1876 = vmatpush3.bf16.msra.mxu1 %v1873_v52  ;;  %v1881_v60 = vpack.c.bf16 %v320_v59, %v319_v56  ;;  %v324_v51 = vld [vmem:[%s2651_s5 + $0x108] sm:$0xff]  ;;  %v325_v59 = vld [vmem:[%s2651_s5 + $0x110] sm:$0xff] }
 0x311   :  { %v582_v8 = vmax.f32 %v578_v1, 0.0  ;;  %v581_v9 = vmax.f32 %v577_v2, 0.0  ;;  %v584_v10 = vmax.f32 %v580_v3, 0.0  ;;  %v583_v11 = vmax.f32 %v579_v6, 0.0  ;;  %v321_v1 = vld [vmem:[%s2651_s5 + $0xf0] sm:$0xff]  ;;  %v322_v2 = vld [vmem:[%s2651_s5 + $0xf8] sm:$0xff] }
 0x312   :  { %1878 = vmatprep.subr.bf16.mxu1 %v1877_v55  ;;  %v1885_v3 = vpack.c.bf16 %v322_v2, %v321_v1  ;;  %v1889_v53 = vpack.c.bf16 %v324_v51, %v323_v50 }
 0x313   :  { %623 = vrot.lane.b32.xlu1 %v582_v8, %s1989_s19  ;;  %621 = vrot.lane.b32.xlu0 %v581_v9, %s1989_s19  ;;  %v606_v54 = vrot.slane %v582_v8, 1  ;;  %v608_v57 = vrot.slane %v583_v11, 1  ;;  %v605_v4 = vrot.slane %v581_v9, 1  ;;  %v610_v7 = vrot.slane %v584_v10, 1 }
 0x314   :  { %v589_v12 = vrot.slane %v581_v9, 7  ;;  %v590_v38 = vrot.slane %v582_v8, 7  ;;  %v592_v13 = vrot.slane %v583_v11, 7  ;;  %v594_v14 = vrot.slane %v584_v10, 7  ;;  %1880 = vmatpush3.bf16.msra.mxu1 %v1877_v55 }
 0x315   :  { %v609_v15 = vsel %vm361_vm6, %v606_v54, %v608_v57  ;;  %v607_v16 = vsel %vm361_vm6, %v605_v4, %v606_v54  ;;  %v611_v17 = vsel %vm361_vm6, %v608_v57, %v610_v7  ;;  %v616_v22 = vsel %vm361_vm6, %v610_v7, 0.0  ;;  %1882 = vmatprep.subr.bf16.mxu1 %v1881_v60 }
 0x316   :  { %v591_v18 = vsel %vm48_vm0, %v589_v12, %v590_v38  ;;  %v595_v19 = vsel %vm48_vm0, %v592_v13, %v594_v14  ;;  %v593_v20 = vsel %vm48_vm0, %v590_v38, %v592_v13  ;;  %v618_v21 = vsel %vm375_vm7, 0.0, %v609_v15 }
 0x317   :  { %627 = vrot.lane.b32.xlu1 %v584_v10, %s1989_s19  ;;  %625 = vrot.lane.b32.xlu0 %v583_v11, %s1989_s19  ;;  %v620_v23 = vsel %vm381_vm8, 0.0, %v616_v22  ;;  %v600_v28 = vsel %vm48_vm0, 0.0, %v589_v12  ;;  %v603_v41 = vsel %vm72_vm5, 0.0, %v593_v20 }
 0x318   :  { %v601_v31 = vsel %vm66_vm1, 0.0, %v600_v28  ;;  %1884 = vmatpush3.bf16.msra.mxu1 %v1881_v60  ;;  %v326_v60 = vld [vmem:[%s2651_s5 + $0x118] sm:$0xff] }
 0x319   :  { %1886 = vmatprep.subr.bf16.mxu1 %v1885_v3 }
 0x31b   :  { %639 = vrot.lane.b32.xlu1 %v618_v21, %s1991_s4  ;;  %637 = vrot.lane.b32.xlu0 %v607_v16, %s1991_s4 }
 0x31c   :  { %1888 = vmatpush3.bf16.msra.mxu1 %v1885_v3 }
 0x31d   :  { %1890 = vmatprep.subr.bf16.mxu1 %v1889_v53 }
 0x31f   :  { %643 = vrot.lane.b32.xlu1 %v620_v23, %s1991_s4  ;;  %641 = vrot.lane.b32.xlu0 %v611_v17, %s1991_s4 }
 0x320   :  { %1892 = vmatpush3.bf16.msra.mxu1 %v1889_v53  ;;  %v328_v53 = vld [vmem:[%s2651_s5 + $0x128] sm:$0xff] }
 0x385   :  { %v624_v26 = vpop.permute.xlu1 %623  ;;  %v622_v27 = vpop.permute.xlu0 %621 }
 0x386   :  { %v650_v33 = vsel %vm115_vm3, %v591_v18, %v624_v26  ;;  %v649_v34 = vsel %vm115_vm3, %v601_v31, %v622_v27 }
 0x389   :  { %v628_v29 = vpop.permute.xlu1 %627  ;;  %v626_v30 = vpop.permute.xlu0 %625 }
 0x38a   :  { %v652_v42 = vsel %vm115_vm3, %v595_v19, %v628_v29  ;;  %v651_v43 = vsel %vm115_vm3, %v603_v41, %v626_v30 }
 0x38d   :  { %v640_v35 = vpop.permute.xlu1 %639  ;;  %v638_v36 = vpop.permute.xlu0 %637 }
 0x38e   :  { %v654_v37 = vsel %vm422_vm9, %v650_v33, %v640_v35  ;;  %v653_v39 = vsel %vm422_vm9, %v649_v34, %v638_v36 }
 0x38f   :  { %1709 = vmatprep.mubr.msk.f32.mxu0 %vm427_vm10, %v653_v39 }
 0x390   :  { %1710 = vmatmul.mubr.msk.f32.vlgmr.msra.gmra.mrb[4].mxu0 %vm427_vm10, %v654_v37 }
 0x391   :  { %v644_v44 = vpop.permute.xlu1 %643  ;;  %v642_v45 = vpop.permute.xlu0 %641 }
 0x392   :  { %v656_v47 = vsel %vm422_vm9, %v652_v42, %v644_v44  ;;  %v655_v48 = vsel %vm422_vm9, %v651_v43, %v642_v45 }
 0x393   :  { %1712 = vmatprep.mubr.msk.f32.mxu0 %vm427_vm10, %v655_v48  ;;  %v796_v48 = vsub.s32 1, %v2108_v25 }
 0x394   :  { %1713 = vmatmul.mubr.msk.f32.gmra.mrb[6].mxu0 %vm427_vm10, %v656_v47 }
 0x463   :  { %v1711_v6 = vpop.f32.mrb[4].mxu0 }
 0x464   :  { %v755_v8 = vsel %vm115_vm3, %v1711_v6, 0.0  ;;  %v769_v9 = vmul.f32 %v1711_v6, %v1711_v6  ;;  %v735_v10 = vpop.f32.mrb[5].mxu0 }
 0x465   :  { %v754_v11 = vsel %vm115_vm3, %v735_v10, 0.0  ;;  %v768_v54 = vmul.f32 %v735_v10, %v735_v10 }
 0x466   :  { %v773_v57 = vsel %vm115_vm3, %v769_v9, 0.0  ;;  %v756_v4 = vadd.f32 %v755_v8, %v754_v11  ;;  %v1893_v11 = vpack.c.bf16 %v326_v60, %v325_v59  ;;  %v330_v59 = vld [vmem:[%s2651_s5 + $0x138] sm:$0xff] }
 0x467   :  { %v772_v7 = vsel %vm115_vm3, %v768_v54, 0.0  ;;  %v1714_v12 = vpop.f32.mrb[6].mxu0 }
 0x468   :  { %v774_v38 = vadd.f32 %v773_v57, %v772_v7  ;;  %v745_v13 = vpop.f32.mrb[7].mxu0  ;;  %v771_v14 = vmul.f32 %v1714_v12, %v1714_v12  ;;  %v759_v18 = vsel %vm115_vm3, %v1714_v12, 0.0  ;;  %1894 = vmatprep.subr.bf16.mxu1 %v1893_v11 }
 0x469   :  { %v757_v15 = vsel %vm115_vm3, %v745_v13, 0.0  ;;  %v770_v16 = vmul.f32 %v745_v13, %v745_v13  ;;  %1896 = vmatpush3.bf16.msra.mxu1 %v1893_v11 }
 0x46a   :  { %v758_v17 = vadd.f32 %v757_v15, %v756_v4  ;;  %v777_v22 = vsel %vm115_vm3, %v771_v14, 0.0 }
 0x46b   :  { %v775_v19 = vsel %vm115_vm3, %v770_v16, 0.0 }
 0x46c   :  { %v760_v20 = vadd.f32 %v759_v18, %v758_v17  ;;  %v776_v21 = vadd.f32 %v775_v19, %v774_v38 }
 0x46e   :  { %v761_v23 = vrot.slane %v760_v20, 4  ;;  %v778_v26 = vadd.f32 %v777_v22, %v776_v21 }
 0x470   :  { %v762_v27 = vadd.f32 %v761_v23, %v760_v20  ;;  %v779_v28 = vrot.slane %v778_v26, 4 }
 0x472   :  { %v763_v29 = vrot.slane %v762_v27, 2  ;;  %v780_v30 = vadd.f32 %v779_v28, %v778_v26 }
 0x474   :  { %v764_v31 = vadd.f32 %v763_v29, %v762_v27  ;;  %v781_v33 = vrot.slane %v780_v30, 2 }
 0x476   :  { %v765_v34 = vrot.slane %v764_v31, 1  ;;  %v782_v35 = vadd.f32 %v781_v33, %v780_v30 }
 0x478   :  { %v766_v36 = vadd.f32 %v765_v34, %v764_v31  ;;  %v783_v37 = vrot.slane %v782_v35, 1 }
 0x47a   :  { %v767_v39 = vmul.f32 0.03125, %v766_v36  ;;  %v784_v41 = vadd.f32 %v783_v37, %v782_v35 }
 0x47c   :  { %v785_v42 = vmul.f32 0.03125, %v784_v41  ;;  %v786_v43 = vmul.f32 %v767_v39, %v767_v39 }
 0x47e   :  { %v787_v44 = vsub.f32 %v785_v42, %v786_v43 }
 0x480   :  { %v788_v45 = vmax.f32 %v787_v44, 0.0 }
 0x482   :  { %v789_v47 = vadd.f32 1e-05, %v788_v45 }
 0x484   :  { %1959 = vrsqrt.f32 %v789_v47 }
 0x48e   :  { %v1960_v49 = vpop.eup %1959 }
 0x48f   :  { %v791_v52 = vmul.f32 %v1960_v49, %v2286_v40 }
 0x491   :  { %v792_v55 = vmul.f32 %v791_v52, %v767_v39  ;;  %v797_v56 = vrot.slane %v791_v52, %v796_v48  ;;  %v327_v52 = vld [vmem:[%s2651_s5 + $0x120] sm:$0xff] }
 0x493   :  { %v793_v1 = vsub.f32 %v2298_v46, %v792_v55  ;;  %v800_v2 = vmul.f32 %v797_v56, %v745_v13  ;;  %v799_v3 = vmul.f32 %v1711_v6, %v797_v56  ;;  %v798_v8 = vmul.f32 %v797_v56, %v735_v10  ;;  %v329_v55 = vld [vmem:[%s2651_s5 + $0x130] sm:$0xff] }
 0x494   :  { %v801_v9 = vmul.f32 %v1714_v12, %v797_v56  ;;  %v1897_v56 = vpack.c.bf16 %v328_v53, %v327_v52  ;;  %v1901_v60 = vpack.c.bf16 %v330_v59, %v329_v55  ;;  %v335_v53 = vld [vmem:[%s2651_s5 + $0x160] sm:$0xff]  ;;  %v336_v55 = vld [vmem:[%s2651_s5 + $0x168] sm:$0xff] }
 0x495   :  { %v805_v54 = vrot.slane %v793_v1, %v796_v48  ;;  %v331_v1 = vld [vmem:[%s2651_s5 + $0x140] sm:$0xff]  ;;  %v1913_v59 = vpack.c.bf16 %v336_v55, %v335_v53 }
 0x496   :  { %1898 = vmatprep.subr.bf16.mxu0 %v1897_v56 }
 0x497   :  { %v808_v57 = vadd.f32 %v805_v54, %v800_v2  ;;  %v807_v4 = vadd.f32 %v805_v54, %v799_v3  ;;  %v806_v7 = vadd.f32 %v805_v54, %v798_v8  ;;  %v809_v38 = vadd.f32 %v805_v54, %v801_v9  ;;  %v332_v2 = vld [vmem:[%s2651_s5 + $0x148] sm:$0xff]  ;;  %1900 = vmatpush3.bf16.msra.mxu0 %v1897_v56  ;;  %v333_v8 = vld [vmem:[%s2651_s5 + $0x150] sm:$0xff]  ;;  %v334_v9 = vld [vmem:[%s2651_s5 + $0x158] sm:$0xff] }
 0x498   :  { %1902 = vmatprep.subr.bf16.mxu0 %v1901_v60  ;;  %v1905_v3 = vpack.c.bf16 %v332_v2, %v331_v1  ;;  %v1909_v11 = vpack.c.bf16 %v334_v9, %v333_v8  ;;  %v337_v2 = vld [vmem:[%s2651_s5 + $0x170] sm:$0xff] }
 0x499   :  { %v2393_v14 = vadd.f32 %v807_v4, %v2189_v63  ;;  %v2396_v15 = vadd.f32 %v806_v7, %v2191_v0  ;;  %v2399_v16 = vadd.f32 %v808_v57, %v2187_v62  ;;  %v2406_v6 = vadd.f32 %v809_v38, %v2197_v58 }
 0x49b   :  { %852 = vrot.lane.b32.xlu1 %v2393_v14, %s1989_s19  ;;  %850 = vrot.lane.b32.xlu0 %v2396_v15, %s1989_s19  ;;  %v835_v10 = vrot.slane %v2393_v14, 1  ;;  %v837_v63 = vrot.slane %v2399_v16, 1  ;;  %v834_v12 = vrot.slane %v2396_v15, 1  ;;  %v839_v0 = vrot.slane %v2406_v6, 1 }
 0x49c   :  { %v818_v21 = vrot.slane %v2396_v15, 7  ;;  %v819_v23 = vrot.slane %v2393_v14, 7  ;;  %v821_v27 = vrot.slane %v2399_v16, 7  ;;  %v823_v33 = vrot.slane %v2406_v6, 7  ;;  %1904 = vmatpush3.bf16.msra.mxu0 %v1901_v60 }
 0x49d   :  { %v838_v62 = vsel %vm361_vm6, %v835_v10, %v837_v63  ;;  %v836_v13 = vsel %vm361_vm6, %v834_v12, %v835_v10  ;;  %v845_v17 = vsel %vm361_vm6, %v839_v0, 0.0  ;;  %v840_v19 = vsel %vm361_vm6, %v837_v63, %v839_v0  ;;  %1906 = vmatprep.subr.bf16.mxu0 %v1905_v3 }
 0x49e   :  { %v847_v58 = vsel %vm375_vm7, 0.0, %v838_v62  ;;  %v849_v18 = vsel %vm381_vm8, 0.0, %v845_v17  ;;  %v829_v26 = vsel %vm48_vm0, 0.0, %v818_v21  ;;  %v820_v30 = vsel %vm48_vm0, %v818_v21, %v819_v23 }
 0x49f   :  { %856 = vrot.lane.b32.xlu1 %v2406_v6, %s1989_s19  ;;  %854 = vrot.lane.b32.xlu0 %v2399_v16, %s1989_s19  ;;  %v830_v31 = vsel %vm66_vm1, 0.0, %v829_v26  ;;  %v822_v36 = vsel %vm48_vm0, %v819_v23, %v821_v27  ;;  %v824_v43 = vsel %vm48_vm0, %v821_v27, %v823_v33 }
 0x4a0   :  { %v832_v44 = vsel %vm72_vm5, 0.0, %v822_v36  ;;  %1908 = vmatpush3.bf16.msra.mxu0 %v1905_v3  ;;  %v338_v3 = vld [vmem:[%s2651_s5 + $0x178] sm:$0xff] }
 0x4a1   :  { %1910 = vmatprep.subr.bf16.mxu0 %v1909_v11 }
 0x4a3   :  { %868 = vrot.lane.b32.xlu1 %v847_v58, %s1991_s4  ;;  %866 = vrot.lane.b32.xlu0 %v836_v13, %s1991_s4 }
 0x4a4   :  { %1912 = vmatpush3.bf16.msra.mxu0 %v1909_v11 }
 0x4a5   :  { %1914 = vmatprep.subr.bf16.mxu0 %v1913_v59 }
 0x4a7   :  { %872 = vrot.lane.b32.xlu1 %v849_v18, %s1991_s4  ;;  %870 = vrot.lane.b32.xlu0 %v840_v19, %s1991_s4 }
 0x4a8   :  { %1916 = vmatpush3.bf16.msra.mxu0 %v1913_v59 }
 0x50d   :  { %v853_v20 = vpop.permute.xlu1 %852  ;;  %v851_v22 = vpop.permute.xlu0 %850 }
 0x50e   :  { %v879_v34 = vsel %vm115_vm3, %v820_v30, %v853_v20  ;;  %v878_v35 = vsel %vm115_vm3, %v830_v31, %v851_v22 }
 0x511   :  { %v857_v28 = vpop.permute.xlu1 %856  ;;  %v855_v29 = vpop.permute.xlu0 %854 }
 0x512   :  { %v881_v45 = vsel %vm115_vm3, %v824_v43, %v857_v28  ;;  %v880_v47 = vsel %vm115_vm3, %v832_v44, %v855_v29 }
 0x515   :  { %v869_v37 = vpop.permute.xlu1 %868  ;;  %v867_v39 = vpop.permute.xlu0 %866 }
 0x516   :  { %v883_v41 = vsel %vm422_vm9, %v879_v34, %v869_v37  ;;  %v882_v42 = vsel %vm422_vm9, %v878_v35, %v867_v39 }
 0x517   :  { %1739 = vmatprep.mubr.msk.f32.mxu1 %vm427_vm10, %v882_v42 }
 0x518   :  { %1740 = vmatmul.mubr.msk.f32.vlgmr.msra.gmra.mrb[4].mxu1 %vm427_vm10, %v883_v41 }
 0x519   :  { %v873_v48 = vpop.permute.xlu1 %872  ;;  %v871_v49 = vpop.permute.xlu0 %870 }
 0x51a   :  { %v885_v50 = vsel %vm422_vm9, %v881_v45, %v873_v48  ;;  %v884_v51 = vsel %vm422_vm9, %v880_v47, %v871_v49 }
 0x51b   :  { %1742 = vmatprep.mubr.msk.f32.mxu1 %vm427_vm10, %v884_v51  ;;  %v1025_v51 = vsub.s32 2, %v2108_v25 }
 0x51c   :  { %1743 = vmatmul.mubr.msk.f32.gmra.mrb[6].mxu1 %vm427_vm10, %v885_v50 }
 0x51d   :  { %1810 = vmatprep.mubr.msk.f32.mxu1 %vm1993_vm11, %v1994_v32 }
 0x5eb   :  { %v1741_v54 = vpop.f32.mrb[4].mxu1 }
 0x5ec   :  { %v984_v57 = vsel %vm115_vm3, %v1741_v54, 0.0  ;;  %v998_v4 = vmul.f32 %v1741_v54, %v1741_v54  ;;  %v964_v7 = vpop.f32.mrb[5].mxu1 }
 0x5ed   :  { %v983_v38 = vsel %vm115_vm3, %v964_v7, 0.0  ;;  %v997_v10 = vmul.f32 %v964_v7, %v964_v7 }
 0x5ee   :  { %v1002_v63 = vsel %vm115_vm3, %v998_v4, 0.0  ;;  %v985_v12 = vadd.f32 %v984_v57, %v983_v38  ;;  %v1917_v38 = vpack.c.bf16 %v338_v3, %v337_v2 }
 0x5ef   :  { %v1001_v62 = vsel %vm115_vm3, %v997_v10, 0.0  ;;  %v1744_v0 = vpop.f32.mrb[6].mxu1 }
 0x5f0   :  { %v1003_v58 = vadd.f32 %v1002_v63, %v1001_v62  ;;  %v974_v13 = vpop.f32.mrb[7].mxu1  ;;  %v1000_v17 = vmul.f32 %v1744_v0, %v1744_v0  ;;  %v988_v21 = vsel %vm115_vm3, %v1744_v0, 0.0  ;;  %1918 = vmatprep.subr.bf16.mxu0 %v1917_v38 }
 0x5f1   :  { %v986_v18 = vsel %vm115_vm3, %v974_v13, 0.0  ;;  %v999_v19 = vmul.f32 %v974_v13, %v974_v13  ;;  %1920 = vmatpush3.bf16.msra.mxu0 %v1917_v38 }
 0x5f2   :  { %v987_v20 = vadd.f32 %v986_v18, %v985_v12  ;;  %v1006_v27 = vsel %vm115_vm3, %v1000_v17, 0.0 }
 0x5f3   :  { %v1004_v22 = vsel %vm115_vm3, %v999_v19, 0.0 }
 0x5f4   :  { %v989_v23 = vadd.f32 %v988_v21, %v987_v20  ;;  %v1005_v26 = vadd.f32 %v1004_v22, %v1003_v58 }
 0x5f6   :  { %v990_v28 = vrot.slane %v989_v23, 4  ;;  %v1007_v29 = vadd.f32 %v1006_v27, %v1005_v26 }
 0x5f8   :  { %v991_v30 = vadd.f32 %v990_v28, %v989_v23  ;;  %v1008_v31 = vrot.slane %v1007_v29, 4 }
 0x5fa   :  { %v992_v33 = vrot.slane %v991_v30, 2  ;;  %v1009_v34 = vadd.f32 %v1008_v31, %v1007_v29 }
 0x5fc   :  { %v993_v35 = vadd.f32 %v992_v33, %v991_v30  ;;  %v1010_v36 = vrot.slane %v1009_v34, 2 }
 0x5fe   :  { %v994_v37 = vrot.slane %v993_v35, 1  ;;  %v1011_v39 = vadd.f32 %v1010_v36, %v1009_v34 }
 0x600   :  { %v995_v41 = vadd.f32 %v994_v37, %v993_v35  ;;  %v1012_v42 = vrot.slane %v1011_v39, 1 }
 0x602   :  { %v996_v43 = vmul.f32 0.03125, %v995_v41  ;;  %v1013_v44 = vadd.f32 %v1012_v42, %v1011_v39 }
 0x604   :  { %v1014_v45 = vmul.f32 0.03125, %v1013_v44  ;;  %v1015_v47 = vmul.f32 %v996_v43, %v996_v43 }
 0x606   :  { %v1016_v48 = vsub.f32 %v1014_v45, %v1015_v47 }
 0x608   :  { %v1017_v49 = vmax.f32 %v1016_v48, 0.0 }
 0x60a   :  { %v1018_v50 = vadd.f32 1e-05, %v1017_v49 }
 0x60c   :  { %1961 = vrsqrt.f32 %v1018_v50 }
 0x616   :  { %v1962_v52 = vpop.eup %1961 }
 0x617   :  { %v1020_v56 = vmul.f32 %v1962_v52, %v2286_v40 }
 0x619   :  { %v1021_v60 = vmul.f32 %v1020_v56, %v996_v43  ;;  %v1026_v1 = vrot.slane %v1020_v56, %v1025_v51 }
 0x61b   :  { %v1029_v8 = vmul.f32 %v1026_v1, %v974_v13  ;;  %v1022_v9 = vsub.f32 %v2298_v46, %v1021_v60  ;;  %v1028_v11 = vmul.f32 %v1741_v54, %v1026_v1  ;;  %v1027_v57 = vmul.f32 %v1026_v1, %v964_v7 }
 0x61c   :  { %v1030_v4 = vmul.f32 %v1744_v0, %v1026_v1  ;;  %v1992_v60 = vmov 0.0|0.0  }
 0x61d   :  { %v1034_v10 = vrot.slane %v1022_v9, %v1025_v51  ;;  %1921 = vmatprep.subr.bf16.mxu0 %v1992_v60  ;;  %1927 = vmatprep.subr.bf16.mxu1 %v1992_v60 }
 0x61f   :  { %v1036_v63 = vadd.f32 %v1034_v10, %v1028_v11  ;;  %v1035_v12 = vadd.f32 %v1034_v10, %v1027_v57  ;;  %v1038_v62 = vadd.f32 %v1034_v10, %v1030_v4  ;;  %v1037_v58 = vadd.f32 %v1034_v10, %v1029_v8 }
 0x621   :  { %v1040_v17 = vmax.f32 %v1036_v63, 0.0  ;;  %v1039_v18 = vmax.f32 %v1035_v12, 0.0  ;;  %v1042_v19 = vmax.f32 %v1038_v62, 0.0  ;;  %v1041_v20 = vmax.f32 %v1037_v58, 0.0 }
 0x623   :  { %1081 = vrot.lane.b32.xlu1 %v1040_v17, %s1989_s19  ;;  %1079 = vrot.lane.b32.xlu0 %v1039_v18, %s1989_s19  ;;  %v1064_v13 = vrot.slane %v1040_v17, 1  ;;  %v1066_v54 = vrot.slane %v1041_v20, 1  ;;  %v1063_v7 = vrot.slane %v1039_v18, 1  ;;  %v1068_v0 = vrot.slane %v1042_v19, 1 }
 0x624   :  { %v1047_v21 = vrot.slane %v1039_v18, 7  ;;  %v1048_v22 = vrot.slane %v1040_v17, 7  ;;  %v1050_v23 = vrot.slane %v1041_v20, 7  ;;  %v1052_v26 = vrot.slane %v1042_v19, 7 }
 0x625   :  { %v1067_v27 = vsel %vm361_vm6, %v1064_v13, %v1066_v54  ;;  %v1065_v28 = vsel %vm361_vm6, %v1063_v7, %v1064_v13  ;;  %v1069_v29 = vsel %vm361_vm6, %v1066_v54, %v1068_v0  ;;  %v1074_v35 = vsel %vm361_vm6, %v1068_v0, 0.0 }
 0x626   :  { %v1049_v30 = vsel %vm48_vm0, %v1047_v21, %v1048_v22  ;;  %v1053_v31 = vsel %vm48_vm0, %v1050_v23, %v1052_v26  ;;  %v1051_v33 = vsel %vm48_vm0, %v1048_v22, %v1050_v23  ;;  %v1076_v34 = vsel %vm375_vm7, 0.0, %v1067_v27 }
 0x627   :  { %1085 = vrot.lane.b32.xlu1 %v1042_v19, %s1989_s19  ;;  %1083 = vrot.lane.b32.xlu0 %v1041_v20, %s1989_s19  ;;  %v1078_v36 = vsel %vm381_vm8, 0.0, %v1074_v35  ;;  %v1058_v41 = vsel %vm48_vm0, 0.0, %v1047_v21  ;;  %v1061_v50 = vsel %vm72_vm5, 0.0, %v1051_v33  ;;  %vm1995_vm0 = vmmov 1  }
 0x628   :  { %v1059_v43 = vsel %vm66_vm1, 0.0, %v1058_v41  ;;  %vm1297_vm7 = vcmask 1041408   ;;  %vm1299_vm8 = vcmask 1043456  }
 0x62b   :  { %1097 = vrot.lane.b32.xlu1 %v1076_v34, %s1991_s4  ;;  %1095 = vrot.lane.b32.xlu0 %v1065_v28, %s1991_s4 }
 0x62f   :  { %1101 = vrot.lane.b32.xlu1 %v1078_v36, %s1991_s4  ;;  %1099 = vrot.lane.b32.xlu0 %v1069_v29, %s1991_s4 }
 0x695   :  { %v1082_v37 = vpop.permute.xlu1 %1081  ;;  %v1080_v39 = vpop.permute.xlu0 %1079 }
 0x696   :  { %v1108_v44 = vsel %vm115_vm3, %v1049_v30, %v1082_v37  ;;  %v1107_v45 = vsel %vm115_vm3, %v1059_v43, %v1080_v39  ;;  %v1276_v43 = vadd.s32 1, %v2108_v25 }
 0x699   :  { %v1086_v42 = vpop.permute.xlu1 %1085  ;;  %v1084_v61 = vpop.permute.xlu0 %1083 }
 0x69a   :  { %v1110_v51 = vsel %vm115_vm3, %v1053_v31, %v1086_v42  ;;  %v1109_v52 = vsel %vm115_vm3, %v1061_v50, %v1084_v61  ;;  %v1254_v50 = vsub.s32 3, %v2108_v25 }
 0x69d   :  { %v1098_v47 = vpop.permute.xlu1 %1097  ;;  %v1096_v5 = vpop.permute.xlu0 %1095 }
 0x69e   :  { %v1112_v48 = vsel %vm422_vm9, %v1108_v44, %v1098_v47  ;;  %v1111_v49 = vsel %vm422_vm9, %v1107_v45, %v1096_v5  ;;  %v1273_v44 = vand.u32 127, %v61_v24  ;;  %v1274_v45 = vmul.u32 16, %v2108_v25 }
 0x69f   :  { %1769 = vmatprep.mubr.msk.f32.mxu0 %vm427_vm10, %v1111_v49  ;;  %v1277_v47 = vmul.u32 16, %v1276_v43 }
 0x6a0   :  { %1770 = vmatmul.mubr.msk.f32.vlgmr.msra.gmra.mrb[8].mxu0 %vm427_vm10, %v1112_v48  ;;  %v1280_v5 = vand.u32 1, %v1273_v44  ;;  %vm2550_vm12 = vcmp.ge.s32.totalorder %v1273_v44, %v1274_v45 }
 0x6a1   :  { %v1102_v53 = vpop.permute.xlu1 %1101  ;;  %v1100_v55 = vpop.permute.xlu0 %1099  ;;  %vm2554_vm13 = vcmp.lt.s32.totalorder %v1273_v44, %v1277_v47 }
 0x6a2   :  { %v1114_v56 = vsel %vm422_vm9, %v1110_v51, %v1102_v53  ;;  %v1113_v59 = vsel %vm422_vm9, %v1109_v52, %v1100_v55  ;;  %vm2559_vm14 = vcmp.eq.s32.totalorder %v1280_v5, 1  ;;  %vm1279_vm15 = vmand %vm2550_vm12, %vm2554_vm13 }
 0x6a3   :  { %1772 = vmatprep.mubr.msk.f32.mxu0 %vm427_vm10, %v1113_v59  ;;  %vm1287_vm1 = vmxor %vm2559_vm14, %vm1995_vm0 }
 0x6a4   :  { %1773 = vmatmul.mubr.msk.f32.gmra.mrb[10].mxu0 %vm427_vm10, %v1114_v56  ;;  %v1541_v56 = vadd.s32 4294967295, %v1277_v47  ;;  %vm1288_vm2 = vmand %vm1279_vm15, %vm1287_vm1  ;;  %v1543_v47 = vld [vmem:[%s2655_s9] ss:$0 sm:$0xff] }
 0x6a5   :  { %1783 = vmatprep.mubr.msk.f32.mxu0 %vm1993_vm11, %v1994_v32  ;;  %vm1282_vm4 = vmand %vm1279_vm15, %vm2559_vm14  ;;  %vm1502_vm11 = vcmask 253952  }
 0x6a6   :  { %vm1284_vm5 = vcmp.ne.s32.totalorder %v1273_v44, %v1541_v56  ;;  %v1996_v44 = vmov 1966171168  }
 0x6a7   :  { %vm1285_vm6 = vmand %vm1282_vm4, %vm1284_vm5  ;;  %v1479_v45 = vunpack.c.l.s4 %v1996_v44 }
 0x773   :  { %v1771_v1 = vpop.f32.mrb[8].mxu0 }
 0x774   :  { %v1213_v2 = vsel %vm115_vm3, %v1771_v1, 0.0  ;;  %v1227_v3 = vmul.f32 %v1771_v1, %v1771_v1  ;;  %v1193_v8 = vpop.f32.mrb[9].mxu0 }
 0x775   :  { %v1212_v9 = vsel %vm115_vm3, %v1193_v8, 0.0  ;;  %v1226_v11 = vmul.f32 %v1193_v8, %v1193_v8 }
 0x776   :  { %v1231_v57 = vsel %vm115_vm3, %v1227_v3, 0.0  ;;  %v1214_v4 = vadd.f32 %v1213_v2, %v1212_v9 }
 0x777   :  { %v1230_v38 = vsel %vm115_vm3, %v1226_v11, 0.0  ;;  %v1774_v10 = vpop.f32.mrb[10].mxu0 }
 0x778   :  { %v1232_v63 = vadd.f32 %v1231_v57, %v1230_v38  ;;  %v1203_v12 = vpop.f32.mrb[11].mxu0  ;;  %v1229_v62 = vmul.f32 %v1774_v10, %v1774_v10  ;;  %v1217_v19 = vsel %vm115_vm3, %v1774_v10, 0.0  ;;  %v1289_v57 = vsel %vm1288_vm2, 0.125, %v1994_v32 }
 0x779   :  { %v1215_v58 = vsel %vm115_vm3, %v1203_v12, 0.0  ;;  %v1228_v17 = vmul.f32 %v1203_v12, %v1203_v12 }
 0x77a   :  { %v1216_v18 = vadd.f32 %v1215_v58, %v1214_v4  ;;  %v1235_v7 = vsel %vm115_vm3, %v1229_v62, 0.0 }
 0x77b   :  { %v1233_v20 = vsel %vm115_vm3, %v1228_v17, 0.0 }
 0x77c   :  { %v1218_v13 = vadd.f32 %v1217_v19, %v1216_v18  ;;  %v1234_v54 = vadd.f32 %v1233_v20, %v1232_v63  ;;  %v1286_v19 = vsel %vm1285_vm6, 0.125, %v1994_v32 }
 0x77e   :  { %v1219_v0 = vrot.slane %v1218_v13, 4  ;;  %v1236_v21 = vadd.f32 %v1235_v7, %v1234_v54  ;;  %v1388_v54 = vld [vmem:[%s2654_s8 + $0x18] sm:$0xff] }
 0x780   :  { %v1220_v22 = vadd.f32 %v1219_v0, %v1218_v13  ;;  %v1237_v23 = vrot.slane %v1236_v21, 4  ;;  %v1389_v0 = vld [vmem:[%s2654_s8 + $0x20] sm:$0xff] }
 0x782   :  { %v1221_v26 = vrot.slane %v1220_v22, 2  ;;  %v1238_v27 = vadd.f32 %v1237_v23, %v1236_v21  ;;  %v1390_v21 = vld [vmem:[%s2654_s8 + $0x28] sm:$0xff]  ;;  %v1391_v23 = vld [vmem:[%s2654_s8 + $0x30] sm:$0xff] }
 0x784   :  { %v1222_v28 = vadd.f32 %v1221_v26, %v1220_v22  ;;  %v1239_v29 = vrot.slane %v1238_v27, 2  ;;  %v1934_v22 = vpack.c.bf16 %v1390_v21, %v1389_v0  ;;  %v1392_v26 = vld [vmem:[%s2654_s8 + $0x38] sm:$0xff] }
 0x786   :  { %v1223_v30 = vrot.slane %v1222_v28, 1  ;;  %v1240_v31 = vadd.f32 %v1239_v29, %v1238_v27  ;;  %v1937_v27 = vpack.c.bf16 %v1392_v26, %v1391_v23  ;;  %v1394_v29 = vld [vmem:[%s2654_s8 + $0x48] sm:$0xff] }
 0x788   :  { %v1224_v33 = vadd.f32 %v1223_v30, %v1222_v28  ;;  %v1241_v34 = vrot.slane %v1240_v31, 1  ;;  %v1393_v28 = vld [vmem:[%s2654_s8 + $0x40] sm:$0xff] }
 0x789   :  { %v1940_v30 = vpack.c.bf16 %v1394_v29, %v1393_v28 }
 0x78a   :  { %v1225_v35 = vmul.f32 0.03125, %v1224_v33  ;;  %v1242_v36 = vadd.f32 %v1241_v34, %v1240_v31  ;;  %v1395_v31 = vld [vmem:[%s2654_s8 + $0x50] sm:$0xff]  ;;  %v1396_v33 = vld [vmem:[%s2654_s8 + $0x58] sm:$0xff] }
 0x78b   :  { %v1943_v34 = vpack.c.bf16 %v1396_v33, %v1395_v31 }
 0x78c   :  { %v1243_v37 = vmul.f32 0.03125, %v1242_v36  ;;  %v1244_v39 = vmul.f32 %v1225_v35, %v1225_v35 }
 0x78e   :  { %v1245_v41 = vsub.f32 %v1243_v37, %v1244_v39 }
 0x790   :  { %v1246_v42 = vmax.f32 %v1245_v41, 0.0 }
 0x792   :  { %v1247_v61 = vadd.f32 1e-05, %v1246_v42 }
 0x794   :  { %1963 = vrsqrt.f32 %v1247_v61 }
 0x79e   :  { %v1964_v52 = vpop.eup %1963 }
 0x79f   :  { %v1249_v24 = vmul.f32 %v1964_v52, %v2286_v40 }
 0x7a1   :  { %v1250_v53 = vmul.f32 %v1249_v24, %v1225_v35  ;;  %v1255_v55 = vrot.slane %v1249_v24, %v1254_v50 }
 0x7a3   :  { %v1251_v59 = vsub.f32 %v2298_v46, %v1250_v53  ;;  %v1258_v2 = vmul.f32 %v1255_v55, %v1203_v12  ;;  %v1256_v3 = vmul.f32 %v1255_v55, %v1193_v8  ;;  %v1257_v9 = vmul.f32 %v1771_v1, %v1255_v55 }
 0x7a4   :  { %v1259_v11 = vmul.f32 %v1774_v10, %v1255_v55  ;;  %v1290_v10 = vsel %vm1282_vm4, 0.125, %v1994_v32  ;;  %v1292_v12 = vrot.slane %v1289_v57, 6 }
 0x7a5   :  { %v1263_v40 = vrot.slane %v1251_v59, %v1254_v50  ;;  %v1295_v20 = vrot.slane %v1290_v10, 4 }
 0x7a6   :  { %v1298_v13 = vsel %vm1297_vm7, %v1286_v19, %v1292_v12 }
 0x7a7   :  { %v1266_v4 = vadd.f32 %v1263_v40, %v1258_v2  ;;  %v1264_v38 = vadd.f32 %v1263_v40, %v1256_v3  ;;  %v1265_v63 = vadd.f32 %v1263_v40, %v1257_v9  ;;  %v1267_v62 = vadd.f32 %v1263_v40, %v1259_v11 }
 0x7a9   :  { %v1270_v58 = vadd.f32 %v1266_v4, %v2399_v16  ;;  %v1268_v46 = vadd.f32 %v1264_v38, %v2396_v15  ;;  %v1269_v1 = vadd.f32 %v1265_v63, %v2393_v14  ;;  %v1271_v8 = vadd.f32 %v1267_v62, %v2406_v6  ;;  %v1385_v14 = vld [vmem:[%s2654_s8] sm:$0xff]  ;;  %v1386_v16 = vld [vmem:[%s2654_s8 + $0x8] sm:$0xff]  ;;  %v1387_v6 = vld [vmem:[%s2654_s8 + $0x10] sm:$0xff] }
 0x7aa   :  { %v1300_v15 = vsel %vm1299_vm8, %v1298_v13, %v1295_v20  ;;  %v1928_v32 = vpack.c.bf16 %v1386_v16, %v1385_v14  ;;  %v1931_v7 = vpack.c.bf16 %v1388_v54, %v1387_v6 }
 0x7ab   :  { %v1922_v17 = vpack.c.bf16 %v1269_v1, %v1268_v46  ;;  %v1925_v18 = vpack.c.bf16 %v1271_v8, %v1270_v58 }
 0x7ac   :  { %1929 = vmatpush3.bf16.msra.mxu1 %v1928_v32 }
 0x7ad   :  { %1923 = vmatpush3.bf16.msra.mxu0 %v1922_v17  ;;  %1930 = vmatprep.subr.bf16.mxu1 %v1992_v60 }
 0x7ae   :  { %1924 = vmatprep.subr.bf16.mxu0 %v1992_v60 }
 0x7b0   :  { %1932 = vmatpush3.bf16.msra.mxu1 %v1931_v7 }
 0x7b1   :  { %1926 = vmatpush3.bf16.msra.mxu0 %v1925_v18  ;;  %1933 = vmatprep.subr.bf16.mxu1 %v1992_v60 }
 0x7b4   :  { %1784 = vmatmul.mubr.msk.f32.vlgmr.msra.gmra.mrb[12].mxu0 %vm115_vm3, %v1300_v15  ;;  %1935 = vmatpush3.bf16.msra.mxu1 %v1934_v22 }
 0x7b5   :  { %1936 = vmatprep.subr.bf16.mxu1 %v1992_v60 }
 0x7b8   :  { %1938 = vmatpush3.bf16.msra.mxu1 %v1937_v27 }
 0x7b9   :  { %1939 = vmatprep.subr.bf16.mxu1 %v1992_v60 }
 0x7bc   :  { %1941 = vmatpush3.bf16.msra.mxu1 %v1940_v30 }
 0x7bd   :  { %1942 = vmatprep.subr.bf16.mxu1 %v1992_v60  ;;  %v1480_v60 = vunpack.c.0.s8 %v1479_v45 }
 0x7bf   :  { %v1483_v5 = vsub.s32 %v1480_v60, %v2108_v25 }
 0x7c0   :  { %1944 = vmatpush3.bf16.msra.mxu1 %v1943_v34 }
 0x887   :  { %v1370_v35 = vpop.f32.mrb[12].mxu0 }
 0x888   :  { %v1375_v36 = vrot.slane %v1370_v35, 2  ;;  %v1379_v37 = vrot.slane %v1370_v35, 4  ;;  %v1785_v39 = vpop.f32.mrb[13].mxu0 }
 0x88a   :  { %1376 = vrot.lane.b32.xlu0 %v1375_v36, %s1989_s19  ;;  %1380 = vrot.lane.b32.xlu1 %v1379_v37, %s1991_s4  ;;  %s1997_s19 = smov [#allocation2]  }
 0x88b   :  { %s1510_s4 = sshll.u32 %s1997_s19, 4  ;;  %s1511_s4 = int_to_ptr.vmem [resolvable:$true] %s1510_s4 }
 0x88c   :  { %s1965_s5 = scalar_lea.vmem %s1511_s4, 32  ;;  %p1970_p1 = scmp.lt.s32.totalorder %s1511_s4, %s1511_s4 }
 0x88d   :  { %p1966_p0 = scmp.ne.s32.totalorder %s1511_s4, %s1965_s5  ;;  %p1971_p2 = scmp.lt.s32.totalorder %s1965_s5, %s1965_s5 }
 0x88f   :  { %p1972_p3 = por %p1971_p2, %p1970_p1 }
 0x891   :  { %p1973_p4 = pnand %p1972_p3, %p1966_p0 }
 0x8fc   :  { %v1377_v41 = vpop.permute.xlu0 %1376  ;;  %v1381_v42 = vpop.permute.xlu1 %1380 }
 0x8fd   :  { %v1383_v61 = vsel %vm115_vm3, %v1370_v35, %v1377_v41 }
 0x8fe   :  { %v1384_v43 = vsel %vm422_vm9, %v1383_v61, %v1381_v42 }
 0x8ff   :  { %1811 = vmatmul.mubr.msk.f32.vlgmr.msra.gmra.mrb[8].mxu1 %vm427_vm10, %v1384_v43 }
 0x9d2   :  { %v1473_v48 = vpop.f32.mrb[8].mxu1 }
 0x9d3   :  { %v1474_v49 = vadd.f32 %v1543_v47, %v1473_v48  ;;  %v1812_v50 = vpop.f32.mrb[9].mxu1 }
 0x9d5   :  { %v1484_v51 = vrot.slane %v1474_v49, %v1483_v5 }
 0x9d7   :  { %v1485_v52 = vcombine.high %v1484_v51, %v1484_v51  ;;  %v1492_v24 = vrot.slane %v1484_v51, %v1483_v5 }
 0x9d9   :  { %v1499_v53 = vrot.slane %v1485_v52, %v1483_v5  ;;  %1503 = vst.msk [vmem:[#allocation2] sm:$0x1] %vm1502_vm11, %v1492_v24 }
 0x9db   :  { %1504 = vst.msk [vmem:[#allocation2 + $0x1] sm:$0x1] %vm1502_vm11, %v1499_v53 }
 0x9dc   :  { %1976 = shalt.err (!%p1973_p4)
}
 0x9dd   :  { %s1977_s13 = scalar_lea.hbm %s2656_s10, 32 }
 0x9de   :  { %p1978_p5 = scmp.ne.s32.totalorder %s2656_s10, %s1977_s13  ;;  %p1981_p6 = scmp.lt.u32.totalorder %s1977_s13, %s2656_s10 }
 0x9e0   :  { %p1983_p7 = pnand %p1981_p6, %p1978_p5 }
 0x9e2   :  { %1986 = shalt.err (!%p1983_p7)
}
 0x9e3   :  { %s1998_s17 = smov 1  }
 0x9e4   :  { %1516 = dma.vmem_to_hbm [thread:$0]  %s1511_s4, 32, %s2656_s10, [#allocation3], %s1990_s20, %s1990_s20, %s1998_s17  }
 0x9e5   :  { %1987 = dma.done.wait [#allocation3], 32  }
 0x9e6   :  { %1988 = vsyncadd [#allocation3], 4294967264 }
 0x9e7   :  { %1520 = vsyncpa [#allocation3], 1 }

</bundles_post_ra>
